<compile_context>
chip_gen: v6e
topology: v6e:2x2x1
jax: 0.10.0
libtpu: 0.0.40
codegen_flags: <defaults>
</compile_context>

<pallas_src>
import functools

import jax
import jax.numpy as jnp
from jax.experimental import pallas as pl
from jax.experimental.pallas import tpu as pltpu


# ---------------------------------------------------------------------------
# Fused kernel: all LSTM layers + final Linear in one invocation.
# refs = (x2d, [wih_t, whh_t, bias] * num_layers, fc_w_t_pad, fc_b_pad,  # in
#         out,                                                            # out
#         h_seq_scratch)                                                  # VMEM
# ---------------------------------------------------------------------------
def _fused_lstm_fc_kernel(*refs, T, B, H, num_layers):
    x_ref = refs[0]
    layer_refs = refs[1:1 + 3 * num_layers]
    fcw_ref = refs[1 + 3 * num_layers]
    fcb_ref = refs[2 + 3 * num_layers]
    out_ref = refs[3 + 3 * num_layers]
    hseq_ref = refs[4 + 3 * num_layers]          # (T*B, H) VMEM scratch

    def cell(h_prev, c_prev, gx_t, whh):
        # Only this recurrent matmul sits on the serial dependency chain.
        gates = gx_t + jnp.dot(h_prev, whh, preferred_element_type=jnp.float32)
        # Whole-tile EUP ops, then slice gates (PyTorch order i, f, g, o).
        s = jax.nn.sigmoid(gates)                # (B, 4H)
        tg = jnp.tanh(gates)                     # (B, 4H)
        i_g = s[:, 0 * H:1 * H]
        f_g = s[:, 1 * H:2 * H]
        g_g = tg[:, 2 * H:3 * H]
        o_g = s[:, 3 * H:4 * H]
        c_new = f_g * c_prev + i_g * g_g
        h_new = o_g * jnp.tanh(c_new)
        return h_new, c_new

    zeros = jnp.zeros((B, H), jnp.float32)
    seq = x_ref[...]                             # (T*B, D_layer)

    h = zeros
    for layer in range(num_layers):
        wih = layer_refs[3 * layer][...]         # (D_layer, 4H)
        whh = layer_refs[3 * layer + 1][...]     # (H, 4H)
        bias = layer_refs[3 * layer + 2][...]    # (1, 4H)

        # Hoisted input projection + bias: one matmul per layer, off the
        # recurrent critical path; bias broadcast happens once, not per step.
        gx = (jnp.dot(seq, wih, preferred_element_type=jnp.float32)
              + bias)                            # (T*B, 4H)

        h = zeros
        c = zeros
        last = (layer == num_layers - 1)
        for t in range(T):                       # statically unrolled (T small)
            h, c = cell(h, c, gx[t * B:(t + 1) * B, :], whh)
            if not last:
                hseq_ref[t * B:(t + 1) * B, :] = h   # stays in VMEM, never HBM

        if not last:
            seq = hseq_ref[...]                  # (T*B, H) input for next layer

    # Final Linear on the last hidden state only (== fc(out[:, -1, :])).
    out_ref[...] = (jnp.dot(h, fcw_ref[...], preferred_element_type=jnp.float32)
                    + fcb_ref[...]).astype(out_ref.dtype)


# ---------------------------------------------------------------------------
# Parameter construction (PyTorch-compatible layout) + full model forward
# ---------------------------------------------------------------------------
def init_params(key, input_dim, hidden_dim, num_layers, output_len):
    params = {"layers": [], "output_len": output_len}
    scale = 1.0 / float(jnp.sqrt(hidden_dim))
    for layer in range(num_layers):
        d_in = input_dim if layer == 0 else hidden_dim
        key, k1, k2, k3, k4 = jax.random.split(key, 5)
        w_ih = jax.random.uniform(k1, (4 * hidden_dim, d_in),
                                  minval=-scale, maxval=scale, dtype=jnp.float32)
        w_hh = jax.random.uniform(k2, (4 * hidden_dim, hidden_dim),
                                  minval=-scale, maxval=scale, dtype=jnp.float32)
        b_ih = jax.random.uniform(k3, (4 * hidden_dim,),
                                  minval=-scale, maxval=scale, dtype=jnp.float32)
        b_hh = jax.random.uniform(k4, (4 * hidden_dim,),
                                  minval=-scale, maxval=scale, dtype=jnp.float32)
        params["layers"].append({
            "wih_t": w_ih.T,                                   # (d_in, 4H)
            "whh_t": w_hh.T,                                   # (H, 4H)
            "bias": (b_ih + b_hh).reshape(1, 4 * hidden_dim),  # fused bias
        })

    key, k5, k6 = jax.random.split(key, 3)
    w_fc = jax.random.uniform(k5, (output_len, hidden_dim),
                              minval=-scale, maxval=scale, dtype=jnp.float32)
    b_fc = jax.random.uniform(k6, (output_len,),
                              minval=-scale, maxval=scale, dtype=jnp.float32)
    # Lane-pad FC output width to a multiple of 128 (padded cols are zero and
    # sliced off outside the kernel) so the output store is unmasked.
    o_pad = ((output_len + 127) // 128) * 128
    params["fc_w_t_pad"] = jnp.pad(w_fc.T, ((0, 0), (0, o_pad - output_len)))
    params["fc_b_pad"] = jnp.pad(b_fc, (0, o_pad - output_len)).reshape(1, o_pad)
    return params


def lstm_model_forward(params, x_btd):
    """x_btd: (B, T, D) batch_first, like the PyTorch module. Returns (B, output_len)."""
    B, T, D = x_btd.shape
    H = params["layers"][0]["whh_t"].shape[0]
    num_layers = len(params["layers"])
    out_len = params["output_len"]
    o_pad = params["fc_w_t_pad"].shape[1]

    # Time-major and flattened once outside the kernel: rows [t*B:(t+1)*B] == x[:, t, :]
    x_2d = jnp.transpose(x_btd, (1, 0, 2)).reshape(T * B, D)

    inputs = [x_2d]
    for lp in params["layers"]:
        inputs += [lp["wih_t"], lp["whh_t"], lp["bias"]]
    inputs += [params["fc_w_t_pad"], params["fc_b_pad"]]

    vmem_spec = pl.BlockSpec(memory_space=pltpu.MemorySpace.VMEM)
    out_pad = pl.pallas_call(
        functools.partial(_fused_lstm_fc_kernel,
                          T=T, B=B, H=H, num_layers=num_layers),
        out_shape=jax.ShapeDtypeStruct((B, o_pad), jnp.float32),
        in_specs=[vmem_spec] * len(inputs),
        out_specs=vmem_spec,
        scratch_shapes=[pltpu.VMEM((T * B, H), jnp.float32)],  # layer-to-layer hidden seq
    )(*inputs)

    return out_pad[:, :out_len]


if __name__ == "__main__":
    B, T, D = 2, 8, 16          # batch, seq_len, input_dim
    HIDDEN, LAYERS, OUT_LEN = 32, 2, 90

    key = jax.random.PRNGKey(0)
    key, kx, kp = jax.random.split(key, 3)
    x = jax.random.normal(kx, (B, T, D), dtype=jnp.float32)
    params = init_params(kp, D, HIDDEN, LAYERS, OUT_LEN)

    out = lstm_model_forward(params, x)
    jax.block_until_ready(out)
    assert out.shape == (B, OUT_LEN), out.shape
    print("KERNEL_OK")
</pallas_src>

<mosaic_0001>
module attributes {stable_mosaic.version = 11 : i64} {
  func.func @_fused_lstm_fc_kernel(%arg0: memref<16x16xf32, #tpu.memory_space<vmem>>, %arg1: memref<16x128xf32, #tpu.memory_space<vmem>>, %arg2: memref<32x128xf32, #tpu.memory_space<vmem>>, %arg3: memref<1x128xf32, #tpu.memory_space<vmem>>, %arg4: memref<32x128xf32, #tpu.memory_space<vmem>>, %arg5: memref<32x128xf32, #tpu.memory_space<vmem>>, %arg6: memref<1x128xf32, #tpu.memory_space<vmem>>, %arg7: memref<32x128xf32, #tpu.memory_space<vmem>>, %arg8: memref<1x128xf32, #tpu.memory_space<vmem>>, %arg9: memref<2x128xf32, #tpu.memory_space<vmem>>, %arg10: memref<16x32xf32, #tpu.memory_space<vmem>>) attributes {dimension_semantics = [], scalar_prefetch = 0 : i64, scratch_operands = 1 : i64, tpu.core_type = #tpu.core_type<tc>} {
    %cst = arith.constant 0.000000e+00 : f32
    %0 = vector.broadcast %cst : f32 to vector<2x32xf32>
    %c0 = arith.constant 0 : index
    %c0_0 = arith.constant 0 : index
    %1 = vector.load %arg0[%c0, %c0_0] : memref<16x16xf32, #tpu.memory_space<vmem>>, vector<16x16xf32>
    %c0_1 = arith.constant 0 : index
    %c0_2 = arith.constant 0 : index
    %2 = vector.load %arg1[%c0_1, %c0_2] : memref<16x128xf32, #tpu.memory_space<vmem>>, vector<16x128xf32>
    %c0_3 = arith.constant 0 : index
    %c0_4 = arith.constant 0 : index
    %3 = vector.load %arg2[%c0_3, %c0_4] : memref<32x128xf32, #tpu.memory_space<vmem>>, vector<32x128xf32>
    %c0_5 = arith.constant 0 : index
    %c0_6 = arith.constant 0 : index
    %4 = vector.load %arg3[%c0_5, %c0_6] : memref<1x128xf32, #tpu.memory_space<vmem>>, vector<1x128xf32>
    %cst_7 = arith.constant dense<0.000000e+00> : vector<16x128xf32>
    %5 = tpu.matmul %1, %2, %cst_7 {dimension_numbers = #tpu.dot_dimension_numbers<[1], [0], [0], [1], [0, 0, 1, 1], [], []>} : vector<16x16xf32>, vector<16x128xf32>, vector<16x128xf32> -> vector<16x128xf32>
    %6 = vector.broadcast %4 : vector<1x128xf32> to vector<16x128xf32>
    %7 = arith.addf %5, %6 : vector<16x128xf32>
    %8 = vector.extract_strided_slice %7 {offsets = [0, 0], sizes = [2, 128], strides = [1, 1]} : vector<16x128xf32> to vector<2x128xf32>
    %cst_8 = arith.constant dense<0.000000e+00> : vector<2x128xf32>
    %9 = tpu.matmul %0, %3, %cst_8 {dimension_numbers = #tpu.dot_dimension_numbers<[1], [0], [0], [1], [0, 0, 1, 1], [], []>} : vector<2x32xf32>, vector<32x128xf32>, vector<2x128xf32> -> vector<2x128xf32>
    %10 = arith.addf %8, %9 : vector<2x128xf32>
    %11 = arith.negf %10 : vector<2x128xf32>
    %12 = math.exp %11 : vector<2x128xf32>
    %cst_9 = arith.constant 1.000000e+00 : f32
    %13 = vector.broadcast %cst_9 : f32 to vector<2x128xf32>
    %14 = arith.addf %13, %12 : vector<2x128xf32>
    %15 = arith.divf %13, %14 : vector<2x128xf32>
    %16 = math.tanh %10 : vector<2x128xf32>
    %17 = vector.extract_strided_slice %15 {offsets = [0, 0], sizes = [2, 32], strides = [1, 1]} : vector<2x128xf32> to vector<2x32xf32>
    %18 = vector.extract_strided_slice %15 {offsets = [0, 32], sizes = [2, 32], strides = [1, 1]} : vector<2x128xf32> to vector<2x32xf32>
    %19 = vector.extract_strided_slice %16 {offsets = [0, 64], sizes = [2, 32], strides = [1, 1]} : vector<2x128xf32> to vector<2x32xf32>
    %20 = vector.extract_strided_slice %15 {offsets = [0, 96], sizes = [2, 32], strides = [1, 1]} : vector<2x128xf32> to vector<2x32xf32>
    %21 = arith.mulf %18, %0 : vector<2x32xf32>
    %22 = arith.mulf %17, %19 : vector<2x32xf32>
    %23 = arith.addf %21, %22 : vector<2x32xf32>
    %24 = math.tanh %23 : vector<2x32xf32>
    %25 = arith.mulf %20, %24 : vector<2x32xf32>
    %c0_10 = arith.constant 0 : index
    %c0_11 = arith.constant 0 : index
    %26 = vector.load %arg10[%c0_10, %c0_11] : memref<16x32xf32, #tpu.memory_space<vmem>>, vector<2x32xf32>
    tpu.vector_store %arg10[%c0_10, %c0_11], %25 {strides = array<i32>} : memref<16x32xf32, #tpu.memory_space<vmem>>, vector<2x32xf32>,
    %27 = vector.extract_strided_slice %7 {offsets = [2, 0], sizes = [2, 128], strides = [1, 1]} : vector<16x128xf32> to vector<2x128xf32>
    %cst_12 = arith.constant dense<0.000000e+00> : vector<2x128xf32>
    %28 = tpu.matmul %25, %3, %cst_12 {dimension_numbers = #tpu.dot_dimension_numbers<[1], [0], [0], [1], [0, 0, 1, 1], [], []>} : vector<2x32xf32>, vector<32x128xf32>, vector<2x128xf32> -> vector<2x128xf32>
    %29 = arith.addf %27, %28 : vector<2x128xf32>
    %30 = arith.negf %29 : vector<2x128xf32>
    %31 = math.exp %30 : vector<2x128xf32>
    %cst_13 = arith.constant 1.000000e+00 : f32
    %32 = vector.broadcast %cst_13 : f32 to vector<2x128xf32>
    %33 = arith.addf %32, %31 : vector<2x128xf32>
    %34 = arith.divf %32, %33 : vector<2x128xf32>
    %35 = math.tanh %29 : vector<2x128xf32>
    %36 = vector.extract_strided_slice %34 {offsets = [0, 0], sizes = [2, 32], strides = [1, 1]} : vector<2x128xf32> to vector<2x32xf32>
    %37 = vector.extract_strided_slice %34 {offsets = [0, 32], sizes = [2, 32], strides = [1, 1]} : vector<2x128xf32> to vector<2x32xf32>
    %38 = vector.extract_strided_slice %35 {offsets = [0, 64], sizes = [2, 32], strides = [1, 1]} : vector<2x128xf32> to vector<2x32xf32>
    %39 = vector.extract_strided_slice %34 {offsets = [0, 96], sizes = [2, 32], strides = [1, 1]} : vector<2x128xf32> to vector<2x32xf32>
    %40 = arith.mulf %37, %23 : vector<2x32xf32>
    %41 = arith.mulf %36, %38 : vector<2x32xf32>
    %42 = arith.addf %40, %41 : vector<2x32xf32>
    %43 = math.tanh %42 : vector<2x32xf32>
    %44 = arith.mulf %39, %43 : vector<2x32xf32>
    %c2 = arith.constant 2 : index
    %c0_14 = arith.constant 0 : index
    %45 = vector.load %arg10[%c2, %c0_14] : memref<16x32xf32, #tpu.memory_space<vmem>>, vector<2x32xf32>
    tpu.vector_store %arg10[%c2, %c0_14], %44 {strides = array<i32>} : memref<16x32xf32, #tpu.memory_space<vmem>>, vector<2x32xf32>,
    %46 = vector.extract_strided_slice %7 {offsets = [4, 0], sizes = [2, 128], strides = [1, 1]} : vector<16x128xf32> to vector<2x128xf32>
    %cst_15 = arith.constant dense<0.000000e+00> : vector<2x128xf32>
    %47 = tpu.matmul %44, %3, %cst_15 {dimension_numbers = #tpu.dot_dimension_numbers<[1], [0], [0], [1], [0, 0, 1, 1], [], []>} : vector<2x32xf32>, vector<32x128xf32>, vector<2x128xf32> -> vector<2x128xf32>
    %48 = arith.addf %46, %47 : vector<2x128xf32>
    %49 = arith.negf %48 : vector<2x128xf32>
    %50 = math.exp %49 : vector<2x128xf32>
    %cst_16 = arith.constant 1.000000e+00 : f32
    %51 = vector.broadcast %cst_16 : f32 to vector<2x128xf32>
    %52 = arith.addf %51, %50 : vector<2x128xf32>
    %53 = arith.divf %51, %52 : vector<2x128xf32>
    %54 = math.tanh %48 : vector<2x128xf32>
    %55 = vector.extract_strided_slice %53 {offsets = [0, 0], sizes = [2, 32], strides = [1, 1]} : vector<2x128xf32> to vector<2x32xf32>
    %56 = vector.extract_strided_slice %53 {offsets = [0, 32], sizes = [2, 32], strides = [1, 1]} : vector<2x128xf32> to vector<2x32xf32>
    %57 = vector.extract_strided_slice %54 {offsets = [0, 64], sizes = [2, 32], strides = [1, 1]} : vector<2x128xf32> to vector<2x32xf32>
    %58 = vector.extract_strided_slice %53 {offsets = [0, 96], sizes = [2, 32], strides = [1, 1]} : vector<2x128xf32> to vector<2x32xf32>
    %59 = arith.mulf %56, %42 : vector<2x32xf32>
    %60 = arith.mulf %55, %57 : vector<2x32xf32>
    %61 = arith.addf %59, %60 : vector<2x32xf32>
    %62 = math.tanh %61 : vector<2x32xf32>
    %63 = arith.mulf %58, %62 : vector<2x32xf32>
    %c4 = arith.constant 4 : index
    %c0_17 = arith.constant 0 : index
    %64 = vector.load %arg10[%c4, %c0_17] : memref<16x32xf32, #tpu.memory_space<vmem>>, vector<2x32xf32>
    tpu.vector_store %arg10[%c4, %c0_17], %63 {strides = array<i32>} : memref<16x32xf32, #tpu.memory_space<vmem>>, vector<2x32xf32>,
    %65 = vector.extract_strided_slice %7 {offsets = [6, 0], sizes = [2, 128], strides = [1, 1]} : vector<16x128xf32> to vector<2x128xf32>
    %cst_18 = arith.constant dense<0.000000e+00> : vector<2x128xf32>
    %66 = tpu.matmul %63, %3, %cst_18 {dimension_numbers = #tpu.dot_dimension_numbers<[1], [0], [0], [1], [0, 0, 1, 1], [], []>} : vector<2x32xf32>, vector<32x128xf32>, vector<2x128xf32> -> vector<2x128xf32>
    %67 = arith.addf %65, %66 : vector<2x128xf32>
    %68 = arith.negf %67 : vector<2x128xf32>
    %69 = math.exp %68 : vector<2x128xf32>
    %cst_19 = arith.constant 1.000000e+00 : f32
    %70 = vector.broadcast %cst_19 : f32 to vector<2x128xf32>
    %71 = arith.addf %70, %69 : vector<2x128xf32>
    %72 = arith.divf %70, %71 : vector<2x128xf32>
    %73 = math.tanh %67 : vector<2x128xf32>
    %74 = vector.extract_strided_slice %72 {offsets = [0, 0], sizes = [2, 32], strides = [1, 1]} : vector<2x128xf32> to vector<2x32xf32>
    %75 = vector.extract_strided_slice %72 {offsets = [0, 32], sizes = [2, 32], strides = [1, 1]} : vector<2x128xf32> to vector<2x32xf32>
    %76 = vector.extract_strided_slice %73 {offsets = [0, 64], sizes = [2, 32], strides = [1, 1]} : vector<2x128xf32> to vector<2x32xf32>
    %77 = vector.extract_strided_slice %72 {offsets = [0, 96], sizes = [2, 32], strides = [1, 1]} : vector<2x128xf32> to vector<2x32xf32>
    %78 = arith.mulf %75, %61 : vector<2x32xf32>
    %79 = arith.mulf %74, %76 : vector<2x32xf32>
    %80 = arith.addf %78, %79 : vector<2x32xf32>
    %81 = math.tanh %80 : vector<2x32xf32>
    %82 = arith.mulf %77, %81 : vector<2x32xf32>
    %c6 = arith.constant 6 : index
    %c0_20 = arith.constant 0 : index
    %83 = vector.load %arg10[%c6, %c0_20] : memref<16x32xf32, #tpu.memory_space<vmem>>, vector<2x32xf32>
    tpu.vector_store %arg10[%c6, %c0_20], %82 {strides = array<i32>} : memref<16x32xf32, #tpu.memory_space<vmem>>, vector<2x32xf32>,
    %84 = vector.extract_strided_slice %7 {offsets = [8, 0], sizes = [2, 128], strides = [1, 1]} : vector<16x128xf32> to vector<2x128xf32>
    %cst_21 = arith.constant dense<0.000000e+00> : vector<2x128xf32>
    %85 = tpu.matmul %82, %3, %cst_21 {dimension_numbers = #tpu.dot_dimension_numbers<[1], [0], [0], [1], [0, 0, 1, 1], [], []>} : vector<2x32xf32>, vector<32x128xf32>, vector<2x128xf32> -> vector<2x128xf32>
    %86 = arith.addf %84, %85 : vector<2x128xf32>
    %87 = arith.negf %86 : vector<2x128xf32>
    %88 = math.exp %87 : vector<2x128xf32>
    %cst_22 = arith.constant 1.000000e+00 : f32
    %89 = vector.broadcast %cst_22 : f32 to vector<2x128xf32>
    %90 = arith.addf %89, %88 : vector<2x128xf32>
    %91 = arith.divf %89, %90 : vector<2x128xf32>
    %92 = math.tanh %86 : vector<2x128xf32>
    %93 = vector.extract_strided_slice %91 {offsets = [0, 0], sizes = [2, 32], strides = [1, 1]} : vector<2x128xf32> to vector<2x32xf32>
    %94 = vector.extract_strided_slice %91 {offsets = [0, 32], sizes = [2, 32], strides = [1, 1]} : vector<2x128xf32> to vector<2x32xf32>
    %95 = vector.extract_strided_slice %92 {offsets = [0, 64], sizes = [2, 32], strides = [1, 1]} : vector<2x128xf32> to vector<2x32xf32>
    %96 = vector.extract_strided_slice %91 {offsets = [0, 96], sizes = [2, 32], strides = [1, 1]} : vector<2x128xf32> to vector<2x32xf32>
    %97 = arith.mulf %94, %80 : vector<2x32xf32>
    %98 = arith.mulf %93, %95 : vector<2x32xf32>
    %99 = arith.addf %97, %98 : vector<2x32xf32>
    %100 = math.tanh %99 : vector<2x32xf32>
    %101 = arith.mulf %96, %100 : vector<2x32xf32>
    %c8 = arith.constant 8 : index
    %c0_23 = arith.constant 0 : index
    %102 = vector.load %arg10[%c8, %c0_23] : memref<16x32xf32, #tpu.memory_space<vmem>>, vector<2x32xf32>
    tpu.vector_store %arg10[%c8, %c0_23], %101 {strides = array<i32>} : memref<16x32xf32, #tpu.memory_space<vmem>>, vector<2x32xf32>,
    %103 = vector.extract_strided_slice %7 {offsets = [10, 0], sizes = [2, 128], strides = [1, 1]} : vector<16x128xf32> to vector<2x128xf32>
    %cst_24 = arith.constant dense<0.000000e+00> : vector<2x128xf32>
    %104 = tpu.matmul %101, %3, %cst_24 {dimension_numbers = #tpu.dot_dimension_numbers<[1], [0], [0], [1], [0, 0, 1, 1], [], []>} : vector<2x32xf32>, vector<32x128xf32>, vector<2x128xf32> -> vector<2x128xf32>
    %105 = arith.addf %103, %104 : vector<2x128xf32>
    %106 = arith.negf %105 : vector<2x128xf32>
    %107 = math.exp %106 : vector<2x128xf32>
    %cst_25 = arith.constant 1.000000e+00 : f32
    %108 = vector.broadcast %cst_25 : f32 to vector<2x128xf32>
    %109 = arith.addf %108, %107 : vector<2x128xf32>
    %110 = arith.divf %108, %109 : vector<2x128xf32>
    %111 = math.tanh %105 : vector<2x128xf32>
    %112 = vector.extract_strided_slice %110 {offsets = [0, 0], sizes = [2, 32], strides = [1, 1]} : vector<2x128xf32> to vector<2x32xf32>
    %113 = vector.extract_strided_slice %110 {offsets = [0, 32], sizes = [2, 32], strides = [1, 1]} : vector<2x128xf32> to vector<2x32xf32>
    %114 = vector.extract_strided_slice %111 {offsets = [0, 64], sizes = [2, 32], strides = [1, 1]} : vector<2x128xf32> to vector<2x32xf32>
    %115 = vector.extract_strided_slice %110 {offsets = [0, 96], sizes = [2, 32], strides = [1, 1]} : vector<2x128xf32> to vector<2x32xf32>
    %116 = arith.mulf %113, %99 : vector<2x32xf32>
    %117 = arith.mulf %112, %114 : vector<2x32xf32>
    %118 = arith.addf %116, %117 : vector<2x32xf32>
    %119 = math.tanh %118 : vector<2x32xf32>
    %120 = arith.mulf %115, %119 : vector<2x32xf32>
    %c10 = arith.constant 10 : index
    %c0_26 = arith.constant 0 : index
    %121 = vector.load %arg10[%c10, %c0_26] : memref<16x32xf32, #tpu.memory_space<vmem>>, vector<2x32xf32>
    tpu.vector_store %arg10[%c10, %c0_26], %120 {strides = array<i32>} : memref<16x32xf32, #tpu.memory_space<vmem>>, vector<2x32xf32>,
    %122 = vector.extract_strided_slice %7 {offsets = [12, 0], sizes = [2, 128], strides = [1, 1]} : vector<16x128xf32> to vector<2x128xf32>
    %cst_27 = arith.constant dense<0.000000e+00> : vector<2x128xf32>
    %123 = tpu.matmul %120, %3, %cst_27 {dimension_numbers = #tpu.dot_dimension_numbers<[1], [0], [0], [1], [0, 0, 1, 1], [], []>} : vector<2x32xf32>, vector<32x128xf32>, vector<2x128xf32> -> vector<2x128xf32>
    %124 = arith.addf %122, %123 : vector<2x128xf32>
    %125 = arith.negf %124 : vector<2x128xf32>
    %126 = math.exp %125 : vector<2x128xf32>
    %cst_28 = arith.constant 1.000000e+00 : f32
    %127 = vector.broadcast %cst_28 : f32 to vector<2x128xf32>
    %128 = arith.addf %127, %126 : vector<2x128xf32>
    %129 = arith.divf %127, %128 : vector<2x128xf32>
    %130 = math.tanh %124 : vector<2x128xf32>
    %131 = vector.extract_strided_slice %129 {offsets = [0, 0], sizes = [2, 32], strides = [1, 1]} : vector<2x128xf32> to vector<2x32xf32>
    %132 = vector.extract_strided_slice %129 {offsets = [0, 32], sizes = [2, 32], strides = [1, 1]} : vector<2x128xf32> to vector<2x32xf32>
    %133 = vector.extract_strided_slice %130 {offsets = [0, 64], sizes = [2, 32], strides = [1, 1]} : vector<2x128xf32> to vector<2x32xf32>
    %134 = vector.extract_strided_slice %129 {offsets = [0, 96], sizes = [2, 32], strides = [1, 1]} : vector<2x128xf32> to vector<2x32xf32>
    %135 = arith.mulf %132, %118 : vector<2x32xf32>
    %136 = arith.mulf %131, %133 : vector<2x32xf32>
    %137 = arith.addf %135, %136 : vector<2x32xf32>
    %138 = math.tanh %137 : vector<2x32xf32>
    %139 = arith.mulf %134, %138 : vector<2x32xf32>
    %c12 = arith.constant 12 : index
    %c0_29 = arith.constant 0 : index
    %140 = vector.load %arg10[%c12, %c0_29] : memref<16x32xf32, #tpu.memory_space<vmem>>, vector<2x32xf32>
    tpu.vector_store %arg10[%c12, %c0_29], %139 {strides = array<i32>} : memref<16x32xf32, #tpu.memory_space<vmem>>, vector<2x32xf32>,
    %141 = vector.extract_strided_slice %7 {offsets = [14, 0], sizes = [2, 128], strides = [1, 1]} : vector<16x128xf32> to vector<2x128xf32>
    %cst_30 = arith.constant dense<0.000000e+00> : vector<2x128xf32>
    %142 = tpu.matmul %139, %3, %cst_30 {dimension_numbers = #tpu.dot_dimension_numbers<[1], [0], [0], [1], [0, 0, 1, 1], [], []>} : vector<2x32xf32>, vector<32x128xf32>, vector<2x128xf32> -> vector<2x128xf32>
    %143 = arith.addf %141, %142 : vector<2x128xf32>
    %144 = arith.negf %143 : vector<2x128xf32>
    %145 = math.exp %144 : vector<2x128xf32>
    %cst_31 = arith.constant 1.000000e+00 : f32
    %146 = vector.broadcast %cst_31 : f32 to vector<2x128xf32>
    %147 = arith.addf %146, %145 : vector<2x128xf32>
    %148 = arith.divf %146, %147 : vector<2x128xf32>
    %149 = math.tanh %143 : vector<2x128xf32>
    %150 = vector.extract_strided_slice %148 {offsets = [0, 0], sizes = [2, 32], strides = [1, 1]} : vector<2x128xf32> to vector<2x32xf32>
    %151 = vector.extract_strided_slice %148 {offsets = [0, 32], sizes = [2, 32], strides = [1, 1]} : vector<2x128xf32> to vector<2x32xf32>
    %152 = vector.extract_strided_slice %149 {offsets = [0, 64], sizes = [2, 32], strides = [1, 1]} : vector<2x128xf32> to vector<2x32xf32>
    %153 = vector.extract_strided_slice %148 {offsets = [0, 96], sizes = [2, 32], strides = [1, 1]} : vector<2x128xf32> to vector<2x32xf32>
    %154 = arith.mulf %151, %137 : vector<2x32xf32>
    %155 = arith.mulf %150, %152 : vector<2x32xf32>
    %156 = arith.addf %154, %155 : vector<2x32xf32>
    %157 = math.tanh %156 : vector<2x32xf32>
    %158 = arith.mulf %153, %157 : vector<2x32xf32>
    %c14 = arith.constant 14 : index
    %c0_32 = arith.constant 0 : index
    %159 = vector.load %arg10[%c14, %c0_32] : memref<16x32xf32, #tpu.memory_space<vmem>>, vector<2x32xf32>
    tpu.vector_store %arg10[%c14, %c0_32], %158 {strides = array<i32>} : memref<16x32xf32, #tpu.memory_space<vmem>>, vector<2x32xf32>,
    %c0_33 = arith.constant 0 : index
    %c0_34 = arith.constant 0 : index
    %160 = vector.load %arg10[%c0_33, %c0_34] : memref<16x32xf32, #tpu.memory_space<vmem>>, vector<16x32xf32>
    %c0_35 = arith.constant 0 : index
    %c0_36 = arith.constant 0 : index
    %161 = vector.load %arg4[%c0_35, %c0_36] : memref<32x128xf32, #tpu.memory_space<vmem>>, vector<32x128xf32>
    %c0_37 = arith.constant 0 : index
    %c0_38 = arith.constant 0 : index
    %162 = vector.load %arg5[%c0_37, %c0_38] : memref<32x128xf32, #tpu.memory_space<vmem>>, vector<32x128xf32>
    %c0_39 = arith.constant 0 : index
    %c0_40 = arith.constant 0 : index
    %163 = vector.load %arg6[%c0_39, %c0_40] : memref<1x128xf32, #tpu.memory_space<vmem>>, vector<1x128xf32>
    %cst_41 = arith.constant dense<0.000000e+00> : vector<16x128xf32>
    %164 = tpu.matmul %160, %161, %cst_41 {dimension_numbers = #tpu.dot_dimension_numbers<[1], [0], [0], [1], [0, 0, 1, 1], [], []>} : vector<16x32xf32>, vector<32x128xf32>, vector<16x128xf32> -> vector<16x128xf32>
    %165 = vector.broadcast %163 : vector<1x128xf32> to vector<16x128xf32>
    %166 = arith.addf %164, %165 : vector<16x128xf32>
    %167 = vector.extract_strided_slice %166 {offsets = [0, 0], sizes = [2, 128], strides = [1, 1]} : vector<16x128xf32> to vector<2x128xf32>
    %cst_42 = arith.constant dense<0.000000e+00> : vector<2x128xf32>
    %168 = tpu.matmul %0, %162, %cst_42 {dimension_numbers = #tpu.dot_dimension_numbers<[1], [0], [0], [1], [0, 0, 1, 1], [], []>} : vector<2x32xf32>, vector<32x128xf32>, vector<2x128xf32> -> vector<2x128xf32>
    %169 = arith.addf %167, %168 : vector<2x128xf32>
    %170 = arith.negf %169 : vector<2x128xf32>
    %171 = math.exp %170 : vector<2x128xf32>
    %cst_43 = arith.constant 1.000000e+00 : f32
    %172 = vector.broadcast %cst_43 : f32 to vector<2x128xf32>
    %173 = arith.addf %172, %171 : vector<2x128xf32>
    %174 = arith.divf %172, %173 : vector<2x128xf32>
    %175 = math.tanh %169 : vector<2x128xf32>
    %176 = vector.extract_strided_slice %174 {offsets = [0, 0], sizes = [2, 32], strides = [1, 1]} : vector<2x128xf32> to vector<2x32xf32>
    %177 = vector.extract_strided_slice %174 {offsets = [0, 32], sizes = [2, 32], strides = [1, 1]} : vector<2x128xf32> to vector<2x32xf32>
    %178 = vector.extract_strided_slice %175 {offsets = [0, 64], sizes = [2, 32], strides = [1, 1]} : vector<2x128xf32> to vector<2x32xf32>
    %179 = vector.extract_strided_slice %174 {offsets = [0, 96], sizes = [2, 32], strides = [1, 1]} : vector<2x128xf32> to vector<2x32xf32>
    %180 = arith.mulf %177, %0 : vector<2x32xf32>
    %181 = arith.mulf %176, %178 : vector<2x32xf32>
    %182 = arith.addf %180, %181 : vector<2x32xf32>
    %183 = math.tanh %182 : vector<2x32xf32>
    %184 = arith.mulf %179, %183 : vector<2x32xf32>
    %185 = vector.extract_strided_slice %166 {offsets = [2, 0], sizes = [2, 128], strides = [1, 1]} : vector<16x128xf32> to vector<2x128xf32>
    %cst_44 = arith.constant dense<0.000000e+00> : vector<2x128xf32>
    %186 = tpu.matmul %184, %162, %cst_44 {dimension_numbers = #tpu.dot_dimension_numbers<[1], [0], [0], [1], [0, 0, 1, 1], [], []>} : vector<2x32xf32>, vector<32x128xf32>, vector<2x128xf32> -> vector<2x128xf32>
    %187 = arith.addf %185, %186 : vector<2x128xf32>
    %188 = arith.negf %187 : vector<2x128xf32>
    %189 = math.exp %188 : vector<2x128xf32>
    %cst_45 = arith.constant 1.000000e+00 : f32
    %190 = vector.broadcast %cst_45 : f32 to vector<2x128xf32>
    %191 = arith.addf %190, %189 : vector<2x128xf32>
    %192 = arith.divf %190, %191 : vector<2x128xf32>
    %193 = math.tanh %187 : vector<2x128xf32>
    %194 = vector.extract_strided_slice %192 {offsets = [0, 0], sizes = [2, 32], strides = [1, 1]} : vector<2x128xf32> to vector<2x32xf32>
    %195 = vector.extract_strided_slice %192 {offsets = [0, 32], sizes = [2, 32], strides = [1, 1]} : vector<2x128xf32> to vector<2x32xf32>
    %196 = vector.extract_strided_slice %193 {offsets = [0, 64], sizes = [2, 32], strides = [1, 1]} : vector<2x128xf32> to vector<2x32xf32>
    %197 = vector.extract_strided_slice %192 {offsets = [0, 96], sizes = [2, 32], strides = [1, 1]} : vector<2x128xf32> to vector<2x32xf32>
    %198 = arith.mulf %195, %182 : vector<2x32xf32>
    %199 = arith.mulf %194, %196 : vector<2x32xf32>
    %200 = arith.addf %198, %199 : vector<2x32xf32>
    %201 = math.tanh %200 : vector<2x32xf32>
    %202 = arith.mulf %197, %201 : vector<2x32xf32>
    %203 = vector.extract_strided_slice %166 {offsets = [4, 0], sizes = [2, 128], strides = [1, 1]} : vector<16x128xf32> to vector<2x128xf32>
    %cst_46 = arith.constant dense<0.000000e+00> : vector<2x128xf32>
    %204 = tpu.matmul %202, %162, %cst_46 {dimension_numbers = #tpu.dot_dimension_numbers<[1], [0], [0], [1], [0, 0, 1, 1], [], []>} : vector<2x32xf32>, vector<32x128xf32>, vector<2x128xf32> -> vector<2x128xf32>
    %205 = arith.addf %203, %204 : vector<2x128xf32>
    %206 = arith.negf %205 : vector<2x128xf32>
    %207 = math.exp %206 : vector<2x128xf32>
    %cst_47 = arith.constant 1.000000e+00 : f32
    %208 = vector.broadcast %cst_47 : f32 to vector<2x128xf32>
    %209 = arith.addf %208, %207 : vector<2x128xf32>
    %210 = arith.divf %208, %209 : vector<2x128xf32>
    %211 = math.tanh %205 : vector<2x128xf32>
    %212 = vector.extract_strided_slice %210 {offsets = [0, 0], sizes = [2, 32], strides = [1, 1]} : vector<2x128xf32> to vector<2x32xf32>
    %213 = vector.extract_strided_slice %210 {offsets = [0, 32], sizes = [2, 32], strides = [1, 1]} : vector<2x128xf32> to vector<2x32xf32>
    %214 = vector.extract_strided_slice %211 {offsets = [0, 64], sizes = [2, 32], strides = [1, 1]} : vector<2x128xf32> to vector<2x32xf32>
    %215 = vector.extract_strided_slice %210 {offsets = [0, 96], sizes = [2, 32], strides = [1, 1]} : vector<2x128xf32> to vector<2x32xf32>
    %216 = arith.mulf %213, %200 : vector<2x32xf32>
    %217 = arith.mulf %212, %214 : vector<2x32xf32>
    %218 = arith.addf %216, %217 : vector<2x32xf32>
    %219 = math.tanh %218 : vector<2x32xf32>
    %220 = arith.mulf %215, %219 : vector<2x32xf32>
    %221 = vector.extract_strided_slice %166 {offsets = [6, 0], sizes = [2, 128], strides = [1, 1]} : vector<16x128xf32> to vector<2x128xf32>
    %cst_48 = arith.constant dense<0.000000e+00> : vector<2x128xf32>
    %222 = tpu.matmul %220, %162, %cst_48 {dimension_numbers = #tpu.dot_dimension_numbers<[1], [0], [0], [1], [0, 0, 1, 1], [], []>} : vector<2x32xf32>, vector<32x128xf32>, vector<2x128xf32> -> vector<2x128xf32>
    %223 = arith.addf %221, %222 : vector<2x128xf32>
    %224 = arith.negf %223 : vector<2x128xf32>
    %225 = math.exp %224 : vector<2x128xf32>
    %cst_49 = arith.constant 1.000000e+00 : f32
    %226 = vector.broadcast %cst_49 : f32 to vector<2x128xf32>
    %227 = arith.addf %226, %225 : vector<2x128xf32>
    %228 = arith.divf %226, %227 : vector<2x128xf32>
    %229 = math.tanh %223 : vector<2x128xf32>
    %230 = vector.extract_strided_slice %228 {offsets = [0, 0], sizes = [2, 32], strides = [1, 1]} : vector<2x128xf32> to vector<2x32xf32>
    %231 = vector.extract_strided_slice %228 {offsets = [0, 32], sizes = [2, 32], strides = [1, 1]} : vector<2x128xf32> to vector<2x32xf32>
    %232 = vector.extract_strided_slice %229 {offsets = [0, 64], sizes = [2, 32], strides = [1, 1]} : vector<2x128xf32> to vector<2x32xf32>
    %233 = vector.extract_strided_slice %228 {offsets = [0, 96], sizes = [2, 32], strides = [1, 1]} : vector<2x128xf32> to vector<2x32xf32>
    %234 = arith.mulf %231, %218 : vector<2x32xf32>
    %235 = arith.mulf %230, %232 : vector<2x32xf32>
    %236 = arith.addf %234, %235 : vector<2x32xf32>
    %237 = math.tanh %236 : vector<2x32xf32>
    %238 = arith.mulf %233, %237 : vector<2x32xf32>
    %239 = vector.extract_strided_slice %166 {offsets = [8, 0], sizes = [2, 128], strides = [1, 1]} : vector<16x128xf32> to vector<2x128xf32>
    %cst_50 = arith.constant dense<0.000000e+00> : vector<2x128xf32>
    %240 = tpu.matmul %238, %162, %cst_50 {dimension_numbers = #tpu.dot_dimension_numbers<[1], [0], [0], [1], [0, 0, 1, 1], [], []>} : vector<2x32xf32>, vector<32x128xf32>, vector<2x128xf32> -> vector<2x128xf32>
    %241 = arith.addf %239, %240 : vector<2x128xf32>
    %242 = arith.negf %241 : vector<2x128xf32>
    %243 = math.exp %242 : vector<2x128xf32>
    %cst_51 = arith.constant 1.000000e+00 : f32
    %244 = vector.broadcast %cst_51 : f32 to vector<2x128xf32>
    %245 = arith.addf %244, %243 : vector<2x128xf32>
    %246 = arith.divf %244, %245 : vector<2x128xf32>
    %247 = math.tanh %241 : vector<2x128xf32>
    %248 = vector.extract_strided_slice %246 {offsets = [0, 0], sizes = [2, 32], strides = [1, 1]} : vector<2x128xf32> to vector<2x32xf32>
    %249 = vector.extract_strided_slice %246 {offsets = [0, 32], sizes = [2, 32], strides = [1, 1]} : vector<2x128xf32> to vector<2x32xf32>
    %250 = vector.extract_strided_slice %247 {offsets = [0, 64], sizes = [2, 32], strides = [1, 1]} : vector<2x128xf32> to vector<2x32xf32>
    %251 = vector.extract_strided_slice %246 {offsets = [0, 96], sizes = [2, 32], strides = [1, 1]} : vector<2x128xf32> to vector<2x32xf32>
    %252 = arith.mulf %249, %236 : vector<2x32xf32>
    %253 = arith.mulf %248, %250 : vector<2x32xf32>
    %254 = arith.addf %252, %253 : vector<2x32xf32>
    %255 = math.tanh %254 : vector<2x32xf32>
    %256 = arith.mulf %251, %255 : vector<2x32xf32>
    %257 = vector.extract_strided_slice %166 {offsets = [10, 0], sizes = [2, 128], strides = [1, 1]} : vector<16x128xf32> to vector<2x128xf32>
    %cst_52 = arith.constant dense<0.000000e+00> : vector<2x128xf32>
    %258 = tpu.matmul %256, %162, %cst_52 {dimension_numbers = #tpu.dot_dimension_numbers<[1], [0], [0], [1], [0, 0, 1, 1], [], []>} : vector<2x32xf32>, vector<32x128xf32>, vector<2x128xf32> -> vector<2x128xf32>
    %259 = arith.addf %257, %258 : vector<2x128xf32>
    %260 = arith.negf %259 : vector<2x128xf32>
    %261 = math.exp %260 : vector<2x128xf32>
    %cst_53 = arith.constant 1.000000e+00 : f32
    %262 = vector.broadcast %cst_53 : f32 to vector<2x128xf32>
    %263 = arith.addf %262, %261 : vector<2x128xf32>
    %264 = arith.divf %262, %263 : vector<2x128xf32>
    %265 = math.tanh %259 : vector<2x128xf32>
    %266 = vector.extract_strided_slice %264 {offsets = [0, 0], sizes = [2, 32], strides = [1, 1]} : vector<2x128xf32> to vector<2x32xf32>
    %267 = vector.extract_strided_slice %264 {offsets = [0, 32], sizes = [2, 32], strides = [1, 1]} : vector<2x128xf32> to vector<2x32xf32>
    %268 = vector.extract_strided_slice %265 {offsets = [0, 64], sizes = [2, 32], strides = [1, 1]} : vector<2x128xf32> to vector<2x32xf32>
    %269 = vector.extract_strided_slice %264 {offsets = [0, 96], sizes = [2, 32], strides = [1, 1]} : vector<2x128xf32> to vector<2x32xf32>
    %270 = arith.mulf %267, %254 : vector<2x32xf32>
    %271 = arith.mulf %266, %268 : vector<2x32xf32>
    %272 = arith.addf %270, %271 : vector<2x32xf32>
    %273 = math.tanh %272 : vector<2x32xf32>
    %274 = arith.mulf %269, %273 : vector<2x32xf32>
    %275 = vector.extract_strided_slice %166 {offsets = [12, 0], sizes = [2, 128], strides = [1, 1]} : vector<16x128xf32> to vector<2x128xf32>
    %cst_54 = arith.constant dense<0.000000e+00> : vector<2x128xf32>
    %276 = tpu.matmul %274, %162, %cst_54 {dimension_numbers = #tpu.dot_dimension_numbers<[1], [0], [0], [1], [0, 0, 1, 1], [], []>} : vector<2x32xf32>, vector<32x128xf32>, vector<2x128xf32> -> vector<2x128xf32>
    %277 = arith.addf %275, %276 : vector<2x128xf32>
    %278 = arith.negf %277 : vector<2x128xf32>
    %279 = math.exp %278 : vector<2x128xf32>
    %cst_55 = arith.constant 1.000000e+00 : f32
    %280 = vector.broadcast %cst_55 : f32 to vector<2x128xf32>
    %281 = arith.addf %280, %279 : vector<2x128xf32>
    %282 = arith.divf %280, %281 : vector<2x128xf32>
    %283 = math.tanh %277 : vector<2x128xf32>
    %284 = vector.extract_strided_slice %282 {offsets = [0, 0], sizes = [2, 32], strides = [1, 1]} : vector<2x128xf32> to vector<2x32xf32>
    %285 = vector.extract_strided_slice %282 {offsets = [0, 32], sizes = [2, 32], strides = [1, 1]} : vector<2x128xf32> to vector<2x32xf32>
    %286 = vector.extract_strided_slice %283 {offsets = [0, 64], sizes = [2, 32], strides = [1, 1]} : vector<2x128xf32> to vector<2x32xf32>
    %287 = vector.extract_strided_slice %282 {offsets = [0, 96], sizes = [2, 32], strides = [1, 1]} : vector<2x128xf32> to vector<2x32xf32>
    %288 = arith.mulf %285, %272 : vector<2x32xf32>
    %289 = arith.mulf %284, %286 : vector<2x32xf32>
    %290 = arith.addf %288, %289 : vector<2x32xf32>
    %291 = math.tanh %290 : vector<2x32xf32>
    %292 = arith.mulf %287, %291 : vector<2x32xf32>
    %293 = vector.extract_strided_slice %166 {offsets = [14, 0], sizes = [2, 128], strides = [1, 1]} : vector<16x128xf32> to vector<2x128xf32>
    %cst_56 = arith.constant dense<0.000000e+00> : vector<2x128xf32>
    %294 = tpu.matmul %292, %162, %cst_56 {dimension_numbers = #tpu.dot_dimension_numbers<[1], [0], [0], [1], [0, 0, 1, 1], [], []>} : vector<2x32xf32>, vector<32x128xf32>, vector<2x128xf32> -> vector<2x128xf32>
    %295 = arith.addf %293, %294 : vector<2x128xf32>
    %296 = arith.negf %295 : vector<2x128xf32>
    %297 = math.exp %296 : vector<2x128xf32>
    %cst_57 = arith.constant 1.000000e+00 : f32
    %298 = vector.broadcast %cst_57 : f32 to vector<2x128xf32>
    %299 = arith.addf %298, %297 : vector<2x128xf32>
    %300 = arith.divf %298, %299 : vector<2x128xf32>
    %301 = math.tanh %295 : vector<2x128xf32>
    %302 = vector.extract_strided_slice %300 {offsets = [0, 0], sizes = [2, 32], strides = [1, 1]} : vector<2x128xf32> to vector<2x32xf32>
    %303 = vector.extract_strided_slice %300 {offsets = [0, 32], sizes = [2, 32], strides = [1, 1]} : vector<2x128xf32> to vector<2x32xf32>
    %304 = vector.extract_strided_slice %301 {offsets = [0, 64], sizes = [2, 32], strides = [1, 1]} : vector<2x128xf32> to vector<2x32xf32>
    %305 = vector.extract_strided_slice %300 {offsets = [0, 96], sizes = [2, 32], strides = [1, 1]} : vector<2x128xf32> to vector<2x32xf32>
    %306 = arith.mulf %303, %290 : vector<2x32xf32>
    %307 = arith.mulf %302, %304 : vector<2x32xf32>
    %308 = arith.addf %306, %307 : vector<2x32xf32>
    %309 = math.tanh %308 : vector<2x32xf32>
    %310 = arith.mulf %305, %309 : vector<2x32xf32>
    %c0_58 = arith.constant 0 : index
    %c0_59 = arith.constant 0 : index
    %311 = vector.load %arg7[%c0_58, %c0_59] : memref<32x128xf32, #tpu.memory_space<vmem>>, vector<32x128xf32>
    %cst_60 = arith.constant dense<0.000000e+00> : vector<2x128xf32>
    %312 = tpu.matmul %310, %311, %cst_60 {dimension_numbers = #tpu.dot_dimension_numbers<[1], [0], [0], [1], [0, 0, 1, 1], [], []>} : vector<2x32xf32>, vector<32x128xf32>, vector<2x128xf32> -> vector<2x128xf32>
    %c0_61 = arith.constant 0 : index
    %c0_62 = arith.constant 0 : index
    %313 = vector.load %arg8[%c0_61, %c0_62] : memref<1x128xf32, #tpu.memory_space<vmem>>, vector<1x128xf32>
    %314 = vector.broadcast %313 : vector<1x128xf32> to vector<2x128xf32>
    %315 = arith.addf %312, %314 : vector<2x128xf32>
    %c0_63 = arith.constant 0 : index
    %c0_64 = arith.constant 0 : index
    %316 = vector.load %arg9[%c0_63, %c0_64] : memref<2x128xf32, #tpu.memory_space<vmem>>, vector<2x128xf32>
    tpu.vector_store %arg9[%c0_63, %c0_64], %315 {strides = array<i32>} : memref<2x128xf32, #tpu.memory_space<vmem>>, vector<2x128xf32>,
    return
  }
}

</mosaic_0001>

<bundles_post_ra>
// kernel: tpu_custom_call.1
= control target key start
LH: loop header
LB: loop body
LE: loop exit
PB: predicated region body
PF: predicated region fallthrough
CT: control target
= control target key end

     0   :  { %14 = vsyncpa [#allocation4], 0  ;;  %s3189_s0 = inlined_call_operand.hbm [shape: f32[16,16], index: 0, kind: input, shape index: {}]   ;;  %s3190_s1 = inlined_call_operand.hbm [shape: f32[16,128], index: 1, kind: input, shape index: {}]   ;;  %s3191_s2 = inlined_call_operand.hbm [shape: f32[32,128], index: 2, kind: input, shape index: {}]   ;;  %s3192_s3 = inlined_call_operand.vmem [shape: f32[1,128], index: 3, kind: input, shape index: {}]   ;;  %s3193_s4 = inlined_call_operand.hbm [shape: f32[32,128], index: 4, kind: input, shape index: {}]   ;;  %s3194_s5 = inlined_call_operand.hbm [shape: f32[32,128], index: 5, kind: input, shape index: {}]   ;;  %s3195_s6 = inlined_call_operand.vmem [shape: f32[1,128], index: 6, kind: input, shape index: {}]   ;;  %s3196_s7 = inlined_call_operand.hbm [shape: f32[32,128], index: 7, kind: input, shape index: {}]   ;;  %s3197_s8 = inlined_call_operand.vmem [shape: f32[1,128], index: 8, kind: input, shape index: {}]   ;;  %s3198_s9 = inlined_call_operand.hbm [shape: f32[2,128], index: 9, kind: output, shape index: {}]  }
   0x1   :  { %15 = vsyncpa [#allocation7], 0 }
   0x2   :  { %16 = vsyncpa [#allocation10], 0 }
   0x3   :  { %17 = vsyncpa [#allocation13], 0 }
   0x4   :  { %18 = vsyncpa [#allocation5], 0  ;;  %s2760_s30 = smov [#allocation6]   ;;  %s2761_s11 = smov [#allocation9]  }
   0x5   :  { %s36_s10 = sshll.u32 %s2760_s30, 4  ;;  %s62_s12 = sshll.u32 %s2761_s11, 4  ;;  %s37_s10 = int_to_ptr.vmem [resolvable:$true] %s36_s10  ;;  %s63_s12 = int_to_ptr.vmem [resolvable:$true] %s62_s12 }
   0x6   :  { %s2618_s13 = scalar_lea.vmem %s37_s10, 256  ;;  %p2623_p1 = scmp.lt.s32.totalorder %s37_s10, %s37_s10 }
   0x7   :  { %p2619_p0 = scmp.ne.s32.totalorder %s37_s10, %s2618_s13  ;;  %p2624_p2 = scmp.lt.s32.totalorder %s2618_s13, %s2618_s13 }
   0x9   :  { %p2625_p3 = por %p2624_p2, %p2623_p1 }
   0xb   :  { %p2626_p4 = pnand %p2625_p3, %p2619_p0 }
   0xd   :  { %2629 = shalt.err (!%p2626_p4)
}
   0xe   :  { %s2762_s14 = smov 128   ;;  %s2763_s15 = smov 8  }
   0xf   :  { %42 = dma.hbm_to_vmem [thread:$0]  %s3190_s1, 256, %s37_s10, [#allocation7], %s2762_s14, %s2762_s14, %s2763_s15  }
  0x10   :  { %s2638_s18 = scalar_lea.vmem %s63_s12, 512  ;;  %p2643_p6 = scmp.lt.s32.totalorder %s63_s12, %s63_s12 }
  0x11   :  { %p2639_p5 = scmp.ne.s32.totalorder %s63_s12, %s2638_s18  ;;  %p2644_p7 = scmp.lt.s32.totalorder %s2638_s18, %s2638_s18 }
  0x13   :  { %p2645_p8 = por %p2644_p7, %p2643_p6 }
  0x15   :  { %p2646_p9 = pnand %p2645_p8, %p2639_p5 }
  0x17   :  { %2649 = shalt.err (!%p2646_p9)
}
  0x18   :  { %68 = dma.hbm_to_vmem [thread:$0]  %s3193_s4, 512, %s63_s12, [#allocation10], %s2762_s14, %s2762_s14, %s2763_s15  }
  0x19   :  { %s2764_s21 = smov [#allocation3]   ;;  %s2765_s23 = smov [#allocation8]  }
  0x1a   :  { %s24_s22 = sshll.u32 %s2764_s21, 4  ;;  %s48_s24 = sshll.u32 %s2765_s23, 4  ;;  %s25_s22 = int_to_ptr.vmem [resolvable:$true] %s24_s22  ;;  %s49_s24 = int_to_ptr.vmem [resolvable:$true] %s48_s24 }
  0x1b   :  { %s2658_s1 = scalar_lea.vmem %s25_s22, 256  ;;  %p2663_p11 = scmp.lt.s32.totalorder %s25_s22, %s25_s22 }
  0x1c   :  { %p2659_p10 = scmp.ne.s32.totalorder %s25_s22, %s2658_s1  ;;  %p2664_p12 = scmp.lt.s32.totalorder %s2658_s1, %s2658_s1 }
  0x1e   :  { %p2665_p13 = por %p2664_p12, %p2663_p11 }
  0x20   :  { %p2666_p0 = pnand %p2665_p13, %p2659_p10 }
  0x22   :  { %2669 = shalt.err (!%p2666_p0)
}
  0x23   :  { %30 = dma.hbm_to_vmem [thread:$0]  %s3189_s0, 256, %s25_s22, [#allocation4], %s2762_s14, %s2762_s14, %s2763_s15  }
  0x24   :  { %s2678_s4 = scalar_lea.vmem %s49_s24, 512  ;;  %p2683_p2 = scmp.lt.s32.totalorder %s49_s24, %s49_s24 }
  0x25   :  { %p2679_p1 = scmp.ne.s32.totalorder %s49_s24, %s2678_s4  ;;  %p2684_p3 = scmp.lt.s32.totalorder %s2678_s4, %s2678_s4 }
  0x27   :  { %p2685_p4 = por %p2684_p3, %p2683_p2 }
  0x29   :  { %p2686_p5 = pnand %p2685_p4, %p2679_p1 }
  0x2b   :  { %2689 = shalt.err (!%p2686_p5)
}
  0x2c   :  { %54 = dma.hbm_to_vmem [thread:$0]  %s3191_s2, 512, %s49_s24, [#allocation7], %s2762_s14, %s2762_s14, %s2763_s15  }
  0x2d   :  { %s2766_s29 = smov [#allocation11]   ;;  %s2767_s10 = smov [#allocation12]  }
  0x2e   :  { %s74_s30 = sshll.u32 %s2766_s29, 4  ;;  %s88_s11 = sshll.u32 %s2767_s10, 4  ;;  %s75_s30 = int_to_ptr.vmem [resolvable:$true] %s74_s30  ;;  %s89_s11 = int_to_ptr.vmem [resolvable:$true] %s88_s11 }
  0x2f   :  { %s2698_s0 = scalar_lea.vmem %s75_s30, 512  ;;  %p2703_p7 = scmp.lt.s32.totalorder %s75_s30, %s75_s30 }
  0x30   :  { %p2699_p6 = scmp.ne.s32.totalorder %s75_s30, %s2698_s0  ;;  %p2704_p8 = scmp.lt.s32.totalorder %s2698_s0, %s2698_s0 }
  0x32   :  { %p2705_p9 = por %p2704_p8, %p2703_p7 }
  0x34   :  { %p2706_p10 = pnand %p2705_p9, %p2699_p6 }
  0x36   :  { %2709 = shalt.err (!%p2706_p10)
}
  0x37   :  { %80 = dma.hbm_to_vmem [thread:$0]  %s3194_s5, 512, %s75_s30, [#allocation10], %s2762_s14, %s2762_s14, %s2763_s15  }
  0x38   :  { %s2718_s2 = scalar_lea.vmem %s89_s11, 512  ;;  %p2723_p12 = scmp.lt.s32.totalorder %s89_s11, %s89_s11 }
  0x39   :  { %p2719_p11 = scmp.ne.s32.totalorder %s89_s11, %s2718_s2  ;;  %p2724_p13 = scmp.lt.s32.totalorder %s2718_s2, %s2718_s2 }
  0x3b   :  { %p2725_p0 = por %p2724_p13, %p2723_p12 }
  0x3d   :  { %p2726_p1 = pnand %p2725_p0, %p2719_p11 }
  0x3f   :  { %2729 = shalt.err (!%p2726_p1)
}
  0x40   :  { %94 = dma.hbm_to_vmem [thread:$0]  %s3196_s7, 512, %s89_s11, [#allocation13], %s2762_s14, %s2762_s14, %s2763_s15  }
  0x41   :  { %2750 = dma.done.wait [#allocation4], 256  }
  0x42   :  { %2751 = vsyncadd [#allocation4], 4294967040 }
  0x43   :  { %2752 = dma.done.wait [#allocation7], 768  }
  0x44   :  { %2753 = vsyncadd [#allocation7], 4294966528 }
  0x45   :  { %2754 = dma.done.wait [#allocation10], 1024  }
  0x46   :  { %2755 = vsyncadd [#allocation10], 4294966272 }
  0x47   :  { %2756 = dma.done.wait [#allocation13], 512  }
  0x48   :  { %2757 = vsyncadd [#allocation13], 4294966784  ;;  %v2768_v0 = vmov 0.0   ;;  %vm2769_vm0 = vmmov 0   ;;  %v118_v1 = vld [vmem:[#allocation6 + $0x8] sm:$0xff]  ;;  %v117_v3 = vld [vmem:[#allocation6] sm:$0xff] }
  0x49   :  { %2271 = vmatprep.subr.mxu1 %v2768_v0  ;;  %2279 = vmatprep.mubr.msk.f32.mxu1 %vm2769_vm0, %v2768_v0  ;;  %v2862_v2 = vld [vmem:[#allocation8 + $0x18] sm:$0xff]  ;;  %v2865_v4 = vld [vmem:[#allocation8 + $0x10] sm:$0xff]  ;;  %v115_v5 = vld [vmem:[#allocation3] sm:$0xff]  ;;  %vm130_vm1 = vcmask 130048   ;;  %s2770_s14 = smov 64   ;;  %vm315_vm2 = vcmask 254976  }
  0x4a   :  { %2264 = vmatprep.subr.mxu0 %v118_v1  ;;  %2272 = vmatpush3.msra.mxu1 %v2862_v2  ;;  %v116_v6 = vld [vmem:[#allocation3 + $0x8] sm:$0xff]  ;;  %v2872_v8 = vld [vmem:[#allocation8] sm:$0xff]  ;;  %v2131_v9 = vld [vmem:[%s3192_s3] ss:$0 sm:$0xff]  ;;  %s2771_s3 = smov 32   ;;  %vm212_vm3 = vcmask 261120  }
  0x4b   :  { %2265 = vmatpush3.msra.mxu0 %v118_v1  ;;  %2273 = vmatprep.subr.mxu1 %v2768_v0  ;;  %v2869_v7 = vld [vmem:[#allocation8 + $0x8] sm:$0xff]  ;;  %vm424_vm4 = vcmask 257026   ;;  %vm648_vm5 = vcmask 261126   ;;  %vm536_vm6 = vcmask 259076   ;;  %s2772_s20 = smov [#allocation14]  }
  0x4c   :  { %2266 = vmatprep.subr.mxu0 %v117_v3  ;;  %2274 = vmatpush3.msra.mxu1 %v2865_v4  ;;  %s2119_s21 = sshll.u32 %s2772_s20, 4  ;;  %s2120_s21 = int_to_ptr.vmem [resolvable:$true] %s2119_s21 }
  0x4d   :  { %2267 = vmatpush3.msra.mxu0 %v117_v3  ;;  %2268 = vmatprep.mubr.msk.f32.mxu0 %vm130_vm1, %v115_v5  ;;  %s2730_s22 = scalar_lea.vmem %s2120_s21, 32  ;;  %p2735_p3 = scmp.lt.s32.totalorder %s2120_s21, %s2120_s21 }
  0x4e   :  { %2275 = vmatprep.subr.mxu1 %v2768_v0  ;;  %2269 = vmatmul.mubr.msk.f32.vlgmr.msra.gmra.mxu0 %vm130_vm1, %v116_v6  ;;  %p2731_p2 = scmp.ne.s32.totalorder %s2120_s21, %s2730_s22  ;;  %p2736_p4 = scmp.lt.s32.totalorder %s2730_s22, %s2730_s22 }
  0x4f   :  { %2276 = vmatpush3.msra.mxu1 %v2869_v7  ;;  %2282 = vmatprep.subr.mxu0 %v2768_v0 }
  0x50   :  { %2277 = vmatprep.subr.mxu1 %v2768_v0  ;;  %2283 = vmatpush3.msra.mxu0 %v2862_v2  ;;  %p2737_p5 = por %p2736_p4, %p2735_p3 }
  0x51   :  { %2278 = vmatpush3.msra.mxu1 %v2872_v8  ;;  %2284 = vmatprep.subr.mxu0 %v2768_v0 }
  0x52   :  { %2280 = vmatmul.mubr.f32.vlgmr.msra.gmra.mxu1 %v2768_v0  ;;  %2285 = vmatpush3.msra.mxu0 %v2865_v4  ;;  %p2738_p6 = pnand %p2737_p5, %p2731_p2 }
  0x53   :  { %2286 = vmatprep.subr.mxu0 %v2768_v0  ;;  %2290 = vmatprep.mubr.msk.f32.mxu0 %vm2769_vm0, %v2768_v0 }
  0x54   :  { %2287 = vmatpush3.msra.mxu0 %v2869_v7  ;;  %2293 = vmatprep.subr.mxu1 %v2768_v0 }
  0x55   :  { %2288 = vmatprep.subr.mxu0 %v2768_v0  ;;  %2294 = vmatpush3.msra.mxu1 %v2862_v2 }
  0x56   :  { %2289 = vmatpush3.msra.mxu0 %v2872_v8  ;;  %2295 = vmatprep.subr.mxu1 %v2768_v0 }
  0x57   :  { %2296 = vmatpush3.msra.mxu1 %v2865_v4  ;;  %2301 = vmatprep.mubr.msk.f32.mxu1 %vm2769_vm0, %v2768_v0 }
  0x58   :  { %2297 = vmatprep.subr.mxu1 %v2768_v0  ;;  %2304 = vmatprep.subr.mxu0 %v2768_v0 }
  0x59   :  { %2298 = vmatpush3.msra.mxu1 %v2869_v7 }
  0x5a   :  { %2299 = vmatprep.subr.mxu1 %v2768_v0 }
  0x5b   :  { %2300 = vmatpush3.msra.mxu1 %v2872_v8 }
  0x5c   :  { %2315 = vmatprep.subr.mxu1 %v2768_v0 }
 0x10e   :  { %v2270_v10 = vpop.f32.mrf.mxu0 }
 0x10f   :  { %v2903_v11 = vadd.f32 %v2270_v10, %v2131_v9 }
 0x110   :  { %v203_v12 = vpop.f32.mrf.mxu0 }
 0x111   :  { %v2905_v13 = vadd.f32 %v2131_v9, %v203_v12 }
 0x112   :  { %v282_v14 = vpop.f32.mrf.mxu1 }
 0x113   :  { %v286_v15 = vadd.f32 %v282_v14, %v2905_v13 }
 0x114   :  { %v2281_v16 = vpop.f32.mrf.mxu1 }
 0x115   :  { %2482 = vtanh.f32 %v286_v15  ;;  %v2134_v18 = vmul.f32 -1.442695, %v286_v15 }
 0x117   :  { %2484 = vpow2.f32 %v2134_v18 }
 0x122   :  { %v2483_v17 = vpop.eup %2482 }
 0x123   :  { %296 = vrot.lane.b32.xlu0 %v2483_v17, %s2770_s14 }
 0x124   :  { %v2485_v19 = vpop.eup %2484 }
 0x125   :  { %v290_v20 = vadd.f32 1.0, %v2485_v19 }
 0x127   :  { %2486 = vrcp.f32 %v290_v20 }
 0x134   :  { %v2487_v21 = vpop.eup %2486 }
 0x135   :  { %v294_v24 = vmul.f32 0.0, %v2487_v21 }
 0x195   :  { %v297_v22 = vpop.permute.xlu0 %296 }
 0x196   :  { %v299_v23 = vmul.f32 %v2487_v21, %v297_v22 }
 0x198   :  { %301 = vrot.lane.b32.xlu0 %v299_v23, %s2771_s3 }
 0x20a   :  { %v302_v25 = vpop.permute.xlu0 %301 }
 0x20b   :  { %v304_v26 = vadd.f32 %v302_v25, %v294_v24 }
 0x20d   :  { %2488 = vtanh.f32 %v304_v26  ;;  %v401_v42 = vrot.slane %v304_v26, 6 }
 0x21a   :  { %v2489_v27 = vpop.eup %2488 }
 0x21b   :  { %307 = vrot.lane.b32.xlu1 %v2489_v27, %s2770_s14 }
 0x28d   :  { %v308_v28 = vpop.permute.xlu1 %307 }
 0x28e   :  { %v310_v29 = vmul.f32 %v2487_v21, %v308_v28 }
 0x290   :  { %312 = vrot.lane.b32.xlu1 %v310_v29, %s2771_s3 }
 0x302   :  { %v313_v30 = vpop.permute.xlu1 %312 }
 0x303   :  { %316 = vst.msk [vmem:[#allocation2] sm:$0x3] %vm315_vm2, %v313_v30  ;;  %2291 = vmatmul.mubr.msk.f32.vlgmr.msra.gmra.mxu0 %vm212_vm3, %v313_v30 }
 0x304   :  { %2305 = vmatpush3.msra.mxu0 %v2862_v2  ;;  %2312 = vmatprep.mubr.msk.f32.mxu0 %vm2769_vm0, %v2768_v0 }
 0x305   :  { %2306 = vmatprep.subr.mxu0 %v2768_v0 }
 0x306   :  { %2307 = vmatpush3.msra.mxu0 %v2865_v4 }
 0x307   :  { %2308 = vmatprep.subr.mxu0 %v2768_v0 }
 0x308   :  { %2309 = vmatpush3.msra.mxu0 %v2869_v7 }
 0x309   :  { %2310 = vmatprep.subr.mxu0 %v2768_v0 }
 0x30a   :  { %2311 = vmatpush3.msra.mxu0 %v2872_v8 }
 0x30b   :  { %2326 = vmatprep.subr.mxu0 %v2768_v0 }
 0x3c3   :  { %v385_v31 = vpop.f32.mrf.mxu0 }
 0x3c4   :  { %v390_v32 = vrot.slane %v385_v31, 6 }
 0x3c5   :  { %v2292_v33 = vpop.f32.mrf.mxu0 }
 0x3c6   :  { %v392_v34 = vadd.f32 %v390_v32, %v2905_v13 }
 0x3c8   :  { %2490 = vtanh.f32 %v392_v34  ;;  %v2136_v36 = vmul.f32 -1.442695, %v392_v34 }
 0x3ca   :  { %2492 = vpow2.f32 %v2136_v36 }
 0x3d5   :  { %v2491_v35 = vpop.eup %2490 }
 0x3d6   :  { %405 = vrot.lane.b32.xlu0 %v2491_v35, %s2770_s14 }
 0x3d7   :  { %v2493_v37 = vpop.eup %2492 }
 0x3d8   :  { %v396_v38 = vadd.f32 1.0, %v2493_v37 }
 0x3da   :  { %2494 = vrcp.f32 %v396_v38 }
 0x3e7   :  { %v2495_v39 = vpop.eup %2494 }
 0x3e8   :  { %v403_v43 = vmul.f32 %v2495_v39, %v401_v42 }
 0x448   :  { %v406_v40 = vpop.permute.xlu0 %405 }
 0x449   :  { %v408_v41 = vmul.f32 %v2495_v39, %v406_v40 }
 0x44b   :  { %410 = vrot.lane.b32.xlu1 %v408_v41, %s2771_s3 }
 0x4bd   :  { %v411_v44 = vpop.permute.xlu1 %410 }
 0x4be   :  { %v413_v45 = vadd.f32 %v411_v44, %v403_v43 }
 0x4c0   :  { %2496 = vtanh.f32 %v413_v45  ;;  %v513_v62 = vrot.slane %v413_v45, 6 }
 0x4cd   :  { %v2497_v46 = vpop.eup %2496 }
 0x4ce   :  { %416 = vrot.lane.b32.xlu0 %v2497_v46, %s2770_s14 }
 0x540   :  { %v417_v47 = vpop.permute.xlu0 %416 }
 0x541   :  { %v2928_v48 = vmul.f32 %v2495_v39, %v417_v47 }
 0x543   :  { %v426_v49 = vrot.slane %v2928_v48, 2 }
 0x545   :  { %427 = vrot.lane.b32.xlu1 %v426_v49, %s2771_s3 }
 0x5b7   :  { %v428_v50 = vpop.permute.xlu1 %427 }
 0x5b8   :  { %2302 = vmatmul.mubr.msk.f32.vlgmr.msra.gmra.mxu1 %vm212_vm3, %v428_v50 }
 0x5b9   :  { %2316 = vmatpush3.msra.mxu1 %v2862_v2  ;;  %2323 = vmatprep.mubr.msk.f32.mxu1 %vm2769_vm0, %v2768_v0 }
 0x5ba   :  { %2317 = vmatprep.subr.mxu1 %v2768_v0 }
 0x5bb   :  { %2318 = vmatpush3.msra.mxu1 %v2865_v4 }
 0x5bc   :  { %2319 = vmatprep.subr.mxu1 %v2768_v0 }
 0x5bd   :  { %2320 = vmatpush3.msra.mxu1 %v2869_v7 }
 0x5be   :  { %2321 = vmatprep.subr.mxu1 %v2768_v0 }
 0x5bf   :  { %2322 = vmatpush3.msra.mxu1 %v2872_v8 }
 0x5c0   :  { %2337 = vmatprep.subr.mxu1 %v2768_v0 }
 0x678   :  { %v497_v51 = vpop.f32.mrf.mxu1 }
 0x679   :  { %v502_v52 = vrot.slane %v497_v51, 4 }
 0x67a   :  { %v2303_v53 = vpop.f32.mrf.mxu1 }
 0x67b   :  { %v504_v54 = vadd.f32 %v502_v52, %v2905_v13 }
 0x67d   :  { %2498 = vtanh.f32 %v504_v54  ;;  %v2138_v56 = vmul.f32 -1.442695, %v504_v54 }
 0x67f   :  { %2500 = vpow2.f32 %v2138_v56 }
 0x68a   :  { %v2499_v55 = vpop.eup %2498 }
 0x68b   :  { %517 = vrot.lane.b32.xlu0 %v2499_v55, %s2770_s14 }
 0x68c   :  { %v2501_v57 = vpop.eup %2500 }
 0x68d   :  { %v508_v58 = vadd.f32 1.0, %v2501_v57 }
 0x68f   :  { %2502 = vrcp.f32 %v508_v58 }
 0x69c   :  { %v2503_v59 = vpop.eup %2502 }
 0x69d   :  { %v515_v63 = vmul.f32 %v2503_v59, %v513_v62 }
 0x6fd   :  { %v518_v60 = vpop.permute.xlu0 %517 }
 0x6fe   :  { %v520_v61 = vmul.f32 %v2503_v59, %v518_v60 }
 0x700   :  { %522 = vrot.lane.b32.xlu1 %v520_v61, %s2771_s3 }
 0x772   :  { %v523_v1 = vpop.permute.xlu1 %522 }
 0x773   :  { %v525_v3 = vadd.f32 %v523_v1, %v515_v63 }
 0x775   :  { %2504 = vtanh.f32 %v525_v3  ;;  %v625_v25 = vrot.slane %v525_v3, 6 }
 0x782   :  { %v2505_v5 = vpop.eup %2504 }
 0x783   :  { %528 = vrot.lane.b32.xlu0 %v2505_v5, %s2770_s14 }
 0x7f5   :  { %v529_v6 = vpop.permute.xlu0 %528 }
 0x7f6   :  { %v2947_v9 = vmul.f32 %v2503_v59, %v529_v6 }
 0x7f8   :  { %v538_v10 = vrot.slane %v2947_v9, 4 }
 0x7fa   :  { %539 = vrot.lane.b32.xlu1 %v538_v10, %s2771_s3 }
 0x86c   :  { %v540_v12 = vpop.permute.xlu1 %539 }
 0x86d   :  { %2313 = vmatmul.mubr.msk.f32.vlgmr.msra.gmra.mxu0 %vm212_vm3, %v540_v12 }
 0x86e   :  { %2327 = vmatpush3.msra.mxu0 %v2862_v2  ;;  %2334 = vmatprep.mubr.msk.f32.mxu0 %vm2769_vm0, %v2768_v0 }
 0x86f   :  { %2328 = vmatprep.subr.mxu0 %v2768_v0 }
 0x870   :  { %2329 = vmatpush3.msra.mxu0 %v2865_v4 }
 0x871   :  { %2330 = vmatprep.subr.mxu0 %v2768_v0 }
 0x872   :  { %2331 = vmatpush3.msra.mxu0 %v2869_v7 }
 0x873   :  { %2332 = vmatprep.subr.mxu0 %v2768_v0 }
 0x874   :  { %2333 = vmatpush3.msra.mxu0 %v2872_v8 }
 0x875   :  { %2348 = vmatprep.subr.mxu0 %v2768_v0 }
 0x92d   :  { %v609_v14 = vpop.f32.mrf.mxu0 }
 0x92e   :  { %v614_v15 = vrot.slane %v609_v14, 2 }
 0x92f   :  { %v2314_v16 = vpop.f32.mrf.mxu0 }
 0x930   :  { %v616_v17 = vadd.f32 %v614_v15, %v2905_v13 }
 0x932   :  { %2506 = vtanh.f32 %v616_v17  ;;  %v2140_v19 = vmul.f32 -1.442695, %v616_v17 }
 0x934   :  { %2508 = vpow2.f32 %v2140_v19 }
 0x93f   :  { %v2507_v18 = vpop.eup %2506 }
 0x940   :  { %629 = vrot.lane.b32.xlu0 %v2507_v18, %s2770_s14 }
 0x941   :  { %v2509_v20 = vpop.eup %2508 }
 0x942   :  { %v620_v21 = vadd.f32 1.0, %v2509_v20 }
 0x944   :  { %2510 = vrcp.f32 %v620_v21 }
 0x951   :  { %v2511_v22 = vpop.eup %2510 }
 0x952   :  { %v627_v26 = vmul.f32 %v2511_v22, %v625_v25 }
 0x9b2   :  { %v630_v23 = vpop.permute.xlu0 %629 }
 0x9b3   :  { %v632_v24 = vmul.f32 %v2511_v22, %v630_v23 }
 0x9b5   :  { %634 = vrot.lane.b32.xlu1 %v632_v24, %s2771_s3 }
 0xa27   :  { %v635_v27 = vpop.permute.xlu1 %634 }
 0xa28   :  { %v637_v28 = vadd.f32 %v635_v27, %v627_v26 }
 0xa2a   :  { %2512 = vtanh.f32 %v637_v28  ;;  %v734_v43 = vrot.slane %v637_v28, 6 }
 0xa37   :  { %v2513_v13 = vpop.eup %2512 }
 0xa38   :  { %640 = vrot.lane.b32.xlu0 %v2513_v13, %s2770_s14 }
 0xaaa   :  { %v641_v29 = vpop.permute.xlu0 %640 }
 0xaab   :  { %v2966_v30 = vmul.f32 %v2511_v22, %v641_v29 }
 0xaad   :  { %v650_v31 = vrot.slane %v2966_v30, 6 }
 0xaaf   :  { %651 = vrot.lane.b32.xlu1 %v650_v31, %s2771_s3 }
 0xb21   :  { %v652_v32 = vpop.permute.xlu1 %651 }
 0xb22   :  { %2324 = vmatmul.mubr.msk.f32.vlgmr.msra.gmra.mxu1 %vm212_vm3, %v652_v32 }
 0xb23   :  { %2338 = vmatpush3.msra.mxu1 %v2862_v2  ;;  %2345 = vmatprep.mubr.msk.f32.mxu1 %vm2769_vm0, %v2768_v0 }
 0xb24   :  { %2339 = vmatprep.subr.mxu1 %v2768_v0 }
 0xb25   :  { %2340 = vmatpush3.msra.mxu1 %v2865_v4 }
 0xb26   :  { %2341 = vmatprep.subr.mxu1 %v2768_v0 }
 0xb27   :  { %2342 = vmatpush3.msra.mxu1 %v2869_v7 }
 0xb28   :  { %2343 = vmatprep.subr.mxu1 %v2768_v0 }
 0xb29   :  { %2344 = vmatpush3.msra.mxu1 %v2872_v8 }
 0xbe2   :  { %v721_v33 = vpop.f32.mrf.mxu1 }
 0xbe3   :  { %v725_v34 = vadd.f32 %v721_v33, %v2903_v11 }
 0xbe4   :  { %v2325_v35 = vpop.f32.mrf.mxu1 }
 0xbe5   :  { %2514 = vtanh.f32 %v725_v34  ;;  %v2142_v37 = vmul.f32 -1.442695, %v725_v34 }
 0xbe7   :  { %2516 = vpow2.f32 %v2142_v37 }
 0xbf2   :  { %v2515_v36 = vpop.eup %2514 }
 0xbf3   :  { %738 = vrot.lane.b32.xlu0 %v2515_v36, %s2770_s14 }
 0xbf4   :  { %v2517_v38 = vpop.eup %2516 }
 0xbf5   :  { %v729_v39 = vadd.f32 1.0, %v2517_v38 }
 0xbf7   :  { %2518 = vrcp.f32 %v729_v39 }
 0xc04   :  { %v2519_v40 = vpop.eup %2518 }
 0xc05   :  { %v736_v44 = vmul.f32 %v2519_v40, %v734_v43 }
 0xc65   :  { %v739_v41 = vpop.permute.xlu0 %738 }
 0xc66   :  { %v741_v42 = vmul.f32 %v2519_v40, %v739_v41 }
 0xc68   :  { %743 = vrot.lane.b32.xlu1 %v741_v42, %s2771_s3 }
 0xcda   :  { %v744_v45 = vpop.permute.xlu1 %743 }
 0xcdb   :  { %v746_v46 = vadd.f32 %v744_v45, %v736_v44 }
 0xcdd   :  { %2520 = vtanh.f32 %v746_v46 }
 0xcea   :  { %v2521_v47 = vpop.eup %2520 }
 0xceb   :  { %749 = vrot.lane.b32.xlu0 %v2521_v47, %s2770_s14 }
 0xd5d   :  { %v750_v49 = vpop.permute.xlu0 %749 }
 0xd5e   :  { %v752_v50 = vmul.f32 %v2519_v40, %v750_v49  ;;  %v1093_v49 = vld [vmem:[#allocation9 + $0x18] sm:$0xff] }
 0xd5f   :  { %2359 = vmatprep.subr.mxu1 %v1093_v49 }
 0xd60   :  { %754 = vrot.lane.b32.xlu1 %v752_v50, %s2771_s3  ;;  %v1092_v50 = vld [vmem:[#allocation9 + $0x10] sm:$0xff] }
 0xdd2   :  { %v755_v51 = vpop.permute.xlu1 %754 }
 0xdd3   :  { %757 = vst.msk [vmem:[#allocation2 + $0x8] sm:$0x3] %vm315_vm2, %v755_v51  ;;  %2335 = vmatmul.mubr.msk.f32.vlgmr.msra.gmra.mxu0 %vm212_vm3, %v755_v51  ;;  %v3030_v51 = vld [vmem:[#allocation11 + $0x18] sm:$0xff] }
 0xdd4   :  { %2349 = vmatpush3.msra.mxu0 %v2862_v2  ;;  %2356 = vmatprep.mubr.msk.f32.mxu0 %vm2769_vm0, %v2768_v0 }
 0xdd5   :  { %2350 = vmatprep.subr.mxu0 %v2768_v0 }
 0xdd6   :  { %2351 = vmatpush3.msra.mxu0 %v2865_v4 }
 0xdd7   :  { %2352 = vmatprep.subr.mxu0 %v2768_v0 }
 0xdd8   :  { %2353 = vmatpush3.msra.mxu0 %v2869_v7 }
 0xdd9   :  { %2354 = vmatprep.subr.mxu0 %v2768_v0 }
 0xdda   :  { %2355 = vmatpush3.msra.mxu0 %v2872_v8  ;;  %v842_v8 = vrot.slane %v746_v46, 6 }
 0xddb   :  { %2370 = vmatprep.subr.mxu0 %v2768_v0 }
 0xe93   :  { %v826_v52 = vpop.f32.mrf.mxu0 }
 0xe94   :  { %v831_v53 = vrot.slane %v826_v52, 6  ;;  %v3033_v52 = vld [vmem:[#allocation11 + $0x10] sm:$0xff] }
 0xe95   :  { %v2336_v2 = vpop.f32.mrf.mxu0 }
 0xe96   :  { %v833_v54 = vadd.f32 %v831_v53, %v2903_v11  ;;  %v1091_v53 = vld [vmem:[#allocation9 + $0x8] sm:$0xff] }
 0xe97   :  { %v3036_v2 = vld [vmem:[#allocation11 + $0x8] sm:$0xff] }
 0xe98   :  { %2522 = vtanh.f32 %v833_v54  ;;  %v2144_v4 = vmul.f32 -1.442695, %v833_v54  ;;  %v3042_v54 = vld [vmem:[#allocation11] sm:$0xff] }
 0xe9a   :  { %2524 = vpow2.f32 %v2144_v4 }
 0xea5   :  { %v2523_v55 = vpop.eup %2522 }
 0xea6   :  { %846 = vrot.lane.b32.xlu0 %v2523_v55, %s2770_s14 }
 0xea7   :  { %v2525_v56 = vpop.eup %2524 }
 0xea8   :  { %v837_v57 = vadd.f32 1.0, %v2525_v56 }
 0xeaa   :  { %2526 = vrcp.f32 %v837_v57 }
 0xeb7   :  { %v2527_v7 = vpop.eup %2526 }
 0xeb8   :  { %v844_v60 = vmul.f32 %v2527_v7, %v842_v8 }
 0xf18   :  { %v847_v58 = vpop.permute.xlu0 %846 }
 0xf19   :  { %v849_v59 = vmul.f32 %v2527_v7, %v847_v58 }
 0xf1b   :  { %851 = vrot.lane.b32.xlu1 %v849_v59, %s2771_s3 }
 0xf8d   :  { %v852_v61 = vpop.permute.xlu1 %851 }
 0xf8e   :  { %v854_v62 = vadd.f32 %v852_v61, %v844_v60  ;;  %v2149_v61 = vld [vmem:[%s3195_s6] ss:$0 sm:$0xff] }
 0xf90   :  { %2528 = vtanh.f32 %v854_v62  ;;  %v953_v23 = vrot.slane %v854_v62, 6 }
 0xf9d   :  { %v2529_v63 = vpop.eup %2528 }
 0xf9e   :  { %857 = vrot.lane.b32.xlu0 %v2529_v63, %s2770_s14 }
0x1010   :  { %v858_v1 = vpop.permute.xlu0 %857 }
0x1011   :  { %v3001_v3 = vmul.f32 %v2527_v7, %v858_v1 }
0x1013   :  { %v866_v5 = vrot.slane %v3001_v3, 2 }
0x1015   :  { %867 = vrot.lane.b32.xlu1 %v866_v5, %s2771_s3 }
0x1087   :  { %v868_v6 = vpop.permute.xlu1 %867 }
0x1088   :  { %2346 = vmatmul.mubr.msk.f32.vlgmr.msra.gmra.mxu1 %vm212_vm3, %v868_v6 }
0x1089   :  { %2360 = vmatpush3.msra.mxu1 %v1093_v49 }
0x108a   :  { %2361 = vmatprep.subr.mxu1 %v1092_v50 }
0x108b   :  { %2362 = vmatpush3.msra.mxu1 %v1092_v50 }
0x108c   :  { %2363 = vmatprep.subr.mxu1 %v1091_v53 }
0x108d   :  { %2364 = vmatpush3.msra.mxu1 %v1091_v53 }
0x1148   :  { %v937_v10 = vpop.f32.mrf.mxu1 }
0x1149   :  { %v942_v12 = vrot.slane %v937_v10, 4 }
0x114a   :  { %v2347_v14 = vpop.f32.mrf.mxu1 }
0x114b   :  { %v944_v15 = vadd.f32 %v942_v12, %v2903_v11 }
0x114d   :  { %2530 = vtanh.f32 %v944_v15  ;;  %v2146_v17 = vmul.f32 -1.442695, %v944_v15 }
0x114f   :  { %2532 = vpow2.f32 %v2146_v17 }
0x115a   :  { %v2531_v16 = vpop.eup %2530 }
0x115b   :  { %957 = vrot.lane.b32.xlu0 %v2531_v16, %s2770_s14 }
0x115c   :  { %v2533_v18 = vpop.eup %2532 }
0x115d   :  { %v948_v19 = vadd.f32 1.0, %v2533_v18 }
0x115f   :  { %2534 = vrcp.f32 %v948_v19 }
0x116c   :  { %v2535_v20 = vpop.eup %2534 }
0x116d   :  { %v955_v24 = vmul.f32 %v2535_v20, %v953_v23 }
0x11cd   :  { %v958_v21 = vpop.permute.xlu0 %957 }
0x11ce   :  { %v960_v22 = vmul.f32 %v2535_v20, %v958_v21 }
0x11d0   :  { %962 = vrot.lane.b32.xlu1 %v960_v22, %s2771_s3 }
0x1242   :  { %v963_v25 = vpop.permute.xlu1 %962 }
0x1243   :  { %v965_v26 = vadd.f32 %v963_v25, %v955_v24 }
0x1245   :  { %2536 = vtanh.f32 %v965_v26 }
0x1252   :  { %v2537_v27 = vpop.eup %2536 }
0x1253   :  { %968 = vrot.lane.b32.xlu0 %v2537_v27, %s2770_s14 }
0x12c5   :  { %v969_v28 = vpop.permute.xlu0 %968 }
0x12c6   :  { %v971_v13 = vmul.f32 %v2535_v20, %v969_v28 }
0x12c8   :  { %v977_v29 = vrot.slane %v971_v13, 4 }
0x12ca   :  { %978 = vrot.lane.b32.xlu1 %v977_v29, %s2771_s3 }
0x133c   :  { %v979_v31 = vpop.permute.xlu1 %978 }
0x133d   :  { %2357 = vmatmul.mubr.msk.f32.vlgmr.msra.gmra.mxu0 %vm212_vm3, %v979_v31 }
0x133e   :  { %2378 = vmatprep.mubr.msk.f32.mxu0 %vm2769_vm0, %v2768_v0  ;;  %2371 = vmatpush3.msra.mxu0 %v3030_v51 }
0x133f   :  { %2372 = vmatprep.subr.mxu0 %v2768_v0 }
0x1340   :  { %2373 = vmatpush3.msra.mxu0 %v3033_v52 }
0x1341   :  { %2374 = vmatprep.subr.mxu0 %v2768_v0 }
0x1342   :  { %2375 = vmatpush3.msra.mxu0 %v3036_v2 }
0x1343   :  { %2376 = vmatprep.subr.mxu0 %v2768_v0 }
0x1344   :  { %2377 = vmatpush3.msra.mxu0 %v3042_v54 }
0x1345   :  { %2379 = vmatmul.mubr.f32.vlgmr.msra.gmra.mxu0 %v2768_v0  ;;  %2392 = vmatprep.subr.mxu0 %v2768_v0 }
0x1346   :  { %2393 = vmatpush3.msra.mxu0 %v3030_v51  ;;  %2400 = vmatprep.mubr.msk.f32.mxu0 %vm2769_vm0, %v2768_v0 }
0x1347   :  { %2394 = vmatprep.subr.mxu0 %v2768_v0 }
0x1348   :  { %2395 = vmatpush3.msra.mxu0 %v3033_v52 }
0x1349   :  { %2396 = vmatprep.subr.mxu0 %v2768_v0 }
0x134a   :  { %2397 = vmatpush3.msra.mxu0 %v3036_v2 }
0x134b   :  { %2398 = vmatprep.subr.mxu0 %v2768_v0 }
0x134c   :  { %2399 = vmatpush3.msra.mxu0 %v3042_v54 }
0x134d   :  { %2414 = vmatprep.subr.mxu0 %v2768_v0 }
0x13fd   :  { %v1048_v32 = vpop.f32.mrf.mxu0 }
0x13fe   :  { %v1053_v33 = vrot.slane %v1048_v32, 2 }
0x13ff   :  { %v2358_v34 = vpop.f32.mrf.mxu0 }
0x1400   :  { %v1055_v35 = vadd.f32 %v1053_v33, %v2903_v11  ;;  %v1064_v11 = vrot.slane %v965_v26, 6 }
0x1402   :  { %2538 = vtanh.f32 %v1055_v35  ;;  %v2148_v37 = vmul.f32 -1.442695, %v1055_v35 }
0x1404   :  { %2540 = vpow2.f32 %v2148_v37 }
0x1405   :  { %v1252_v8 = vpop.f32.mrf.mxu0 }
0x1407   :  { %v2380_v60 = vpop.f32.mrf.mxu0 }
0x140f   :  { %v2539_v36 = vpop.eup %2538 }
0x1410   :  { %1068 = vrot.lane.b32.xlu0 %v2539_v36, %s2770_s14 }
0x1411   :  { %v2541_v38 = vpop.eup %2540 }
0x1412   :  { %v1059_v39 = vadd.f32 1.0, %v2541_v38 }
0x1414   :  { %2542 = vrcp.f32 %v1059_v39 }
0x1421   :  { %v2543_v40 = vpop.eup %2542 }
0x1422   :  { %v1066_v43 = vmul.f32 %v2543_v40, %v1064_v11 }
0x1482   :  { %v1069_v41 = vpop.permute.xlu0 %1068 }
0x1483   :  { %v1071_v42 = vmul.f32 %v2543_v40, %v1069_v41 }
0x1485   :  { %1073 = vrot.lane.b32.xlu1 %v1071_v42, %s2771_s3 }
0x1489   :  { %421 = vrot.lane.b32.xlu1 %v2928_v48, %s2771_s3 }
0x148d   :  { %645 = vrot.lane.b32.xlu1 %v2966_v30, %s2771_s3 }
0x1491   :  { %973 = vrot.lane.b32.xlu1 %v971_v13, %s2771_s3 }
0x14f7   :  { %v1074_v44 = vpop.permute.xlu1 %1073 }
0x14f8   :  { %v1076_v45 = vadd.f32 %v1074_v44, %v1066_v43 }
0x14fa   :  { %2544 = vtanh.f32 %v1076_v45 }
0x14fb   :  { %v422_v46 = vpop.permute.xlu1 %421 }
0x14fc   :  { %425 = vst.msk [vmem:[#allocation2] sm:$0xc] %vm424_vm4, %v422_v46 }
0x14ff   :  { %v646_v47 = vpop.permute.xlu1 %645 }
0x1500   :  { %649 = vst.msk [vmem:[#allocation2] sm:$0xc0] %vm648_vm5, %v646_v47 }
0x1503   :  { %v974_v48 = vpop.permute.xlu1 %973 }
0x1504   :  { %976 = vst.msk [vmem:[#allocation2 + $0x8] sm:$0x30] %vm536_vm6, %v974_v48 }
0x1507   :  { %v2545_v30 = vpop.eup %2544 }
0x1508   :  { %1079 = vrot.lane.b32.xlu0 %v2545_v30, %s2770_s14 }
0x150c   :  { %533 = vrot.lane.b32.xlu0 %v2947_v9, %s2771_s3  ;;  %v1090_v9 = vld [vmem:[#allocation9] sm:$0xff] }
0x150d   :  { %2365 = vmatprep.subr.mxu1 %v1090_v9 }
0x150e   :  { %2366 = vmatpush3.msra.mxu1 %v1090_v9 }
0x150f   :  { %2381 = vmatprep.subr.mxu1 %v2768_v0 }
0x1510   :  { %862 = vrot.lane.b32.xlu0 %v3001_v3, %s2771_s3 }
0x157a   :  { %v1080_v55 = vpop.permute.xlu0 %1079 }
0x157b   :  { %v1082_v4 = vmul.f32 %v2543_v40, %v1080_v55 }
0x157d   :  { %1084 = vrot.lane.b32.xlu0 %v1082_v4, %s2771_s3 }
0x157e   :  { %v534_v56 = vpop.permute.xlu0 %533 }
0x157f   :  { %537 = vst.msk [vmem:[#allocation2] sm:$0x30] %vm536_vm6, %v534_v56 }
0x1582   :  { %v863_v57 = vpop.permute.xlu0 %862 }
0x1583   :  { %865 = vst.msk [vmem:[#allocation2 + $0x8] sm:$0xc] %vm424_vm4, %v863_v57 }
0x1586   :  { %v1088_v7 = vld [vmem:[#allocation2] sm:$0xff] }
0x1587   :  { %2367 = vmatprep.mubr.msk.f32.mxu1 %vm212_vm3, %v1088_v7 }
0x15ef   :  { %v1085_v58 = vpop.permute.xlu0 %1084 }
0x15f0   :  { %1087 = vst.msk [vmem:[#allocation2 + $0x8] sm:$0xc0] %vm648_vm5, %v1085_v58 }
0x15f7   :  { %v1089_v59 = vld [vmem:[#allocation2 + $0x8] sm:$0xff] }
0x15f8   :  { %2368 = vmatmul.mubr.msk.f32.vlgmr.msra.gmra.mxu1 %vm212_vm3, %v1089_v59 }
0x15f9   :  { %2382 = vmatpush3.msra.mxu1 %v3030_v51  ;;  %2389 = vmatprep.mubr.msk.f32.mxu1 %vm2769_vm0, %v2768_v0 }
0x15fa   :  { %2383 = vmatprep.subr.mxu1 %v2768_v0 }
0x15fb   :  { %2384 = vmatpush3.msra.mxu1 %v3033_v52 }
0x15fc   :  { %2385 = vmatprep.subr.mxu1 %v2768_v0 }
0x15fd   :  { %2386 = vmatpush3.msra.mxu1 %v3036_v2 }
0x15fe   :  { %2387 = vmatprep.subr.mxu1 %v2768_v0 }
0x15ff   :  { %2388 = vmatpush3.msra.mxu1 %v3042_v54 }
0x1600   :  { %2403 = vmatprep.subr.mxu1 %v2768_v0 }
0x16b8   :  { %v2369_v62 = vpop.f32.mrf.mxu1 }
0x16b9   :  { %v3077_v63 = vadd.f32 %v2369_v62, %v2149_v61 }
0x16ba   :  { %v1177_v1 = vpop.f32.mrf.mxu1 }
0x16bb   :  { %v3079_v3 = vadd.f32 %v2149_v61, %v1177_v1 }
0x16bd   :  { %v1256_v5 = vadd.f32 %v1252_v8, %v3079_v3 }
0x16bf   :  { %2546 = vtanh.f32 %v1256_v5  ;;  %v2152_v10 = vmul.f32 -1.442695, %v1256_v5 }
0x16c1   :  { %2548 = vpow2.f32 %v2152_v10 }
0x16cc   :  { %v2547_v6 = vpop.eup %2546 }
0x16cd   :  { %1266 = vrot.lane.b32.xlu1 %v2547_v6, %s2770_s14 }
0x16ce   :  { %v2549_v12 = vpop.eup %2548 }
0x16cf   :  { %v1260_v14 = vadd.f32 1.0, %v2549_v12 }
0x16d1   :  { %2550 = vrcp.f32 %v1260_v14 }
0x16de   :  { %v2551_v15 = vpop.eup %2550 }
0x16df   :  { %v1264_v18 = vmul.f32 0.0, %v2551_v15 }
0x173f   :  { %v1267_v16 = vpop.permute.xlu1 %1266 }
0x1740   :  { %v1269_v17 = vmul.f32 %v2551_v15, %v1267_v16 }
0x1742   :  { %1271 = vrot.lane.b32.xlu0 %v1269_v17, %s2771_s3 }
0x17b4   :  { %v1272_v19 = vpop.permute.xlu0 %1271 }
0x17b5   :  { %v1274_v20 = vadd.f32 %v1272_v19, %v1264_v18 }
0x17b7   :  { %2552 = vtanh.f32 %v1274_v20  ;;  %v1368_v36 = vrot.slane %v1274_v20, 6 }
0x17c4   :  { %v2553_v21 = vpop.eup %2552 }
0x17c5   :  { %1277 = vrot.lane.b32.xlu1 %v2553_v21, %s2770_s14 }
0x1837   :  { %v1278_v22 = vpop.permute.xlu1 %1277 }
0x1838   :  { %v1280_v23 = vmul.f32 %v2551_v15, %v1278_v22 }
0x183a   :  { %1282 = vrot.lane.b32.xlu0 %v1280_v23, %s2771_s3 }
0x18ac   :  { %v1283_v24 = vpop.permute.xlu0 %1282 }
0x18ad   :  { %2390 = vmatmul.mubr.msk.f32.vlgmr.msra.gmra.mxu1 %vm212_vm3, %v1283_v24 }
0x18ae   :  { %2404 = vmatpush3.msra.mxu1 %v3030_v51  ;;  %2411 = vmatprep.mubr.msk.f32.mxu1 %vm2769_vm0, %v2768_v0 }
0x18af   :  { %2405 = vmatprep.subr.mxu1 %v2768_v0 }
0x18b0   :  { %2406 = vmatpush3.msra.mxu1 %v3033_v52 }
0x18b1   :  { %2407 = vmatprep.subr.mxu1 %v2768_v0 }
0x18b2   :  { %2408 = vmatpush3.msra.mxu1 %v3036_v2 }
0x18b3   :  { %2409 = vmatprep.subr.mxu1 %v2768_v0 }
0x18b4   :  { %2410 = vmatpush3.msra.mxu1 %v3042_v54 }
0x18b5   :  { %2425 = vmatprep.subr.mxu1 %v2768_v0 }
0x196d   :  { %v1352_v25 = vpop.f32.mrf.mxu1 }
0x196e   :  { %v1357_v26 = vrot.slane %v1352_v25, 6 }
0x196f   :  { %v2391_v27 = vpop.f32.mrf.mxu1 }
0x1970   :  { %v1359_v28 = vadd.f32 %v1357_v26, %v3079_v3 }
0x1972   :  { %2554 = vtanh.f32 %v1359_v28  ;;  %v2154_v29 = vmul.f32 -1.442695, %v1359_v28 }
0x1974   :  { %2556 = vpow2.f32 %v2154_v29 }
0x197f   :  { %v2555_v13 = vpop.eup %2554 }
0x1980   :  { %1372 = vrot.lane.b32.xlu1 %v2555_v13, %s2770_s14 }
0x1981   :  { %v2557_v31 = vpop.eup %2556 }
0x1982   :  { %v1363_v32 = vadd.f32 1.0, %v2557_v31 }
0x1984   :  { %2558 = vrcp.f32 %v1363_v32 }
0x1991   :  { %v2559_v33 = vpop.eup %2558 }
0x1992   :  { %v1370_v37 = vmul.f32 %v2559_v33, %v1368_v36 }
0x19f2   :  { %v1373_v34 = vpop.permute.xlu1 %1372 }
0x19f3   :  { %v1375_v35 = vmul.f32 %v2559_v33, %v1373_v34 }
0x19f5   :  { %1377 = vrot.lane.b32.xlu0 %v1375_v35, %s2771_s3 }
0x1a67   :  { %v1378_v38 = vpop.permute.xlu0 %1377 }
0x1a68   :  { %v1380_v39 = vadd.f32 %v1378_v38, %v1370_v37 }
0x1a6a   :  { %2560 = vtanh.f32 %v1380_v39  ;;  %v1475_v4 = vrot.slane %v1380_v39, 6 }
0x1a77   :  { %v2561_v40 = vpop.eup %2560 }
0x1a78   :  { %1383 = vrot.lane.b32.xlu1 %v2561_v40, %s2770_s14 }
0x1aea   :  { %v1384_v41 = vpop.permute.xlu1 %1383 }
0x1aeb   :  { %v1386_v42 = vmul.f32 %v2559_v33, %v1384_v41 }
0x1aed   :  { %v1388_v11 = vrot.slane %v1386_v42, 2 }
0x1aef   :  { %1389 = vrot.lane.b32.xlu0 %v1388_v11, %s2771_s3 }
0x1b61   :  { %v1390_v43 = vpop.permute.xlu0 %1389 }
0x1b62   :  { %2401 = vmatmul.mubr.msk.f32.vlgmr.msra.gmra.mxu0 %vm212_vm3, %v1390_v43 }
0x1b63   :  { %2415 = vmatpush3.msra.mxu0 %v3030_v51  ;;  %2422 = vmatprep.mubr.msk.f32.mxu0 %vm2769_vm0, %v2768_v0 }
0x1b64   :  { %2416 = vmatprep.subr.mxu0 %v2768_v0 }
0x1b65   :  { %2417 = vmatpush3.msra.mxu0 %v3033_v52 }
0x1b66   :  { %2418 = vmatprep.subr.mxu0 %v2768_v0 }
0x1b67   :  { %2419 = vmatpush3.msra.mxu0 %v3036_v2 }
0x1b68   :  { %2420 = vmatprep.subr.mxu0 %v2768_v0 }
0x1b69   :  { %2421 = vmatpush3.msra.mxu0 %v3042_v54 }
0x1b6a   :  { %2436 = vmatprep.subr.mxu0 %v2768_v0 }
0x1c22   :  { %v1459_v44 = vpop.f32.mrf.mxu0 }
0x1c23   :  { %v1464_v45 = vrot.slane %v1459_v44, 4 }
0x1c24   :  { %v2402_v46 = vpop.f32.mrf.mxu0 }
0x1c25   :  { %v1466_v47 = vadd.f32 %v1464_v45, %v3079_v3 }
0x1c27   :  { %2562 = vtanh.f32 %v1466_v47  ;;  %v2156_v30 = vmul.f32 -1.442695, %v1466_v47 }
0x1c29   :  { %2564 = vpow2.f32 %v2156_v30 }
0x1c34   :  { %v2563_v48 = vpop.eup %2562 }
0x1c35   :  { %1479 = vrot.lane.b32.xlu1 %v2563_v48, %s2770_s14 }
0x1c36   :  { %v2565_v49 = vpop.eup %2564 }
0x1c37   :  { %v1470_v50 = vadd.f32 1.0, %v2565_v49 }
0x1c39   :  { %2566 = vrcp.f32 %v1470_v50 }
0x1c46   :  { %v2567_v53 = vpop.eup %2566 }
0x1c47   :  { %v1477_v56 = vmul.f32 %v2567_v53, %v1475_v4 }
0x1ca7   :  { %v1480_v9 = vpop.permute.xlu1 %1479 }
0x1ca8   :  { %v1482_v55 = vmul.f32 %v2567_v53, %v1480_v9 }
0x1caa   :  { %1484 = vrot.lane.b32.xlu0 %v1482_v55, %s2771_s3 }
0x1d1c   :  { %v1485_v57 = vpop.permute.xlu0 %1484 }
0x1d1d   :  { %v1487_v7 = vadd.f32 %v1485_v57, %v1477_v56 }
0x1d1f   :  { %2568 = vtanh.f32 %v1487_v7  ;;  %v1582_v19 = vrot.slane %v1487_v7, 6 }
0x1d2c   :  { %v2569_v58 = vpop.eup %2568 }
0x1d2d   :  { %1490 = vrot.lane.b32.xlu1 %v2569_v58, %s2770_s14 }
0x1d9f   :  { %v1491_v59 = vpop.permute.xlu1 %1490 }
0x1da0   :  { %v1493_v8 = vmul.f32 %v2567_v53, %v1491_v59 }
0x1da2   :  { %v1495_v60 = vrot.slane %v1493_v8, 4 }
0x1da4   :  { %1496 = vrot.lane.b32.xlu0 %v1495_v60, %s2771_s3 }
0x1e16   :  { %v1497_v61 = vpop.permute.xlu0 %1496 }
0x1e17   :  { %2412 = vmatmul.mubr.msk.f32.vlgmr.msra.gmra.mxu1 %vm212_vm3, %v1497_v61 }
0x1e18   :  { %2426 = vmatpush3.msra.mxu1 %v3030_v51  ;;  %2433 = vmatprep.mubr.msk.f32.mxu1 %vm2769_vm0, %v2768_v0 }
0x1e19   :  { %2427 = vmatprep.subr.mxu1 %v2768_v0 }
0x1e1a   :  { %2428 = vmatpush3.msra.mxu1 %v3033_v52 }
0x1e1b   :  { %2429 = vmatprep.subr.mxu1 %v2768_v0 }
0x1e1c   :  { %2430 = vmatpush3.msra.mxu1 %v3036_v2 }
0x1e1d   :  { %2431 = vmatprep.subr.mxu1 %v2768_v0 }
0x1e1e   :  { %2432 = vmatpush3.msra.mxu1 %v3042_v54 }
0x1e1f   :  { %2447 = vmatprep.subr.mxu1 %v2768_v0 }
0x1ed7   :  { %v1566_v62 = vpop.f32.mrf.mxu1 }
0x1ed8   :  { %v1571_v1 = vrot.slane %v1566_v62, 2 }
0x1ed9   :  { %v2413_v5 = vpop.f32.mrf.mxu1 }
0x1eda   :  { %v1573_v6 = vadd.f32 %v1571_v1, %v3079_v3 }
0x1edc   :  { %2570 = vtanh.f32 %v1573_v6  ;;  %v2158_v12 = vmul.f32 -1.442695, %v1573_v6 }
0x1ede   :  { %2572 = vpow2.f32 %v2158_v12 }
0x1ee9   :  { %v2571_v10 = vpop.eup %2570 }
0x1eea   :  { %1586 = vrot.lane.b32.xlu1 %v2571_v10, %s2770_s14 }
0x1eeb   :  { %v2573_v14 = vpop.eup %2572 }
0x1eec   :  { %v1577_v15 = vadd.f32 1.0, %v2573_v14 }
0x1eee   :  { %2574 = vrcp.f32 %v1577_v15 }
0x1efb   :  { %v2575_v16 = vpop.eup %2574 }
0x1efc   :  { %v1584_v20 = vmul.f32 %v2575_v16, %v1582_v19 }
0x1f5c   :  { %v1587_v17 = vpop.permute.xlu1 %1586 }
0x1f5d   :  { %v1589_v18 = vmul.f32 %v2575_v16, %v1587_v17 }
0x1f5f   :  { %1591 = vrot.lane.b32.xlu0 %v1589_v18, %s2771_s3 }
0x1fd1   :  { %v1592_v21 = vpop.permute.xlu0 %1591 }
0x1fd2   :  { %v1594_v22 = vadd.f32 %v1592_v21, %v1584_v20 }
0x1fd4   :  { %2576 = vtanh.f32 %v1594_v22  ;;  %v1686_v37 = vrot.slane %v1594_v22, 6 }
0x1fe1   :  { %v2577_v3 = vpop.eup %2576 }
0x1fe2   :  { %1597 = vrot.lane.b32.xlu1 %v2577_v3, %s2770_s14 }
0x2054   :  { %v1598_v23 = vpop.permute.xlu1 %1597 }
0x2055   :  { %v1600_v24 = vmul.f32 %v2575_v16, %v1598_v23 }
0x2057   :  { %v1602_v25 = vrot.slane %v1600_v24, 6 }
0x2059   :  { %1603 = vrot.lane.b32.xlu0 %v1602_v25, %s2771_s3 }
0x20cb   :  { %v1604_v26 = vpop.permute.xlu0 %1603 }
0x20cc   :  { %2423 = vmatmul.mubr.msk.f32.vlgmr.msra.gmra.mxu0 %vm212_vm3, %v1604_v26 }
0x20cd   :  { %2437 = vmatpush3.msra.mxu0 %v3030_v51  ;;  %2444 = vmatprep.mubr.msk.f32.mxu0 %vm2769_vm0, %v2768_v0 }
0x20ce   :  { %2438 = vmatprep.subr.mxu0 %v2768_v0 }
0x20cf   :  { %2439 = vmatpush3.msra.mxu0 %v3033_v52 }
0x20d0   :  { %2440 = vmatprep.subr.mxu0 %v2768_v0 }
0x20d1   :  { %2441 = vmatpush3.msra.mxu0 %v3036_v2 }
0x20d2   :  { %2442 = vmatprep.subr.mxu0 %v2768_v0 }
0x20d3   :  { %2443 = vmatpush3.msra.mxu0 %v3042_v54 }
0x20d4   :  { %2458 = vmatprep.subr.mxu0 %v2768_v0 }
0x218c   :  { %v1673_v27 = vpop.f32.mrf.mxu0 }
0x218d   :  { %v1677_v28 = vadd.f32 %v1673_v27, %v3077_v63 }
0x218e   :  { %v2424_v13 = vpop.f32.mrf.mxu0 }
0x218f   :  { %2578 = vtanh.f32 %v1677_v28  ;;  %v2160_v31 = vmul.f32 -1.442695, %v1677_v28 }
0x2191   :  { %2580 = vpow2.f32 %v2160_v31 }
0x219c   :  { %v2579_v29 = vpop.eup %2578 }
0x219d   :  { %1690 = vrot.lane.b32.xlu1 %v2579_v29, %s2770_s14 }
0x219e   :  { %v2581_v32 = vpop.eup %2580 }
0x219f   :  { %v1681_v33 = vadd.f32 1.0, %v2581_v32 }
0x21a1   :  { %2582 = vrcp.f32 %v1681_v33 }
0x21ae   :  { %v2583_v34 = vpop.eup %2582 }
0x21af   :  { %v1688_v38 = vmul.f32 %v2583_v34, %v1686_v37 }
0x220f   :  { %v1691_v35 = vpop.permute.xlu1 %1690 }
0x2210   :  { %v1693_v36 = vmul.f32 %v2583_v34, %v1691_v35 }
0x2212   :  { %1695 = vrot.lane.b32.xlu0 %v1693_v36, %s2771_s3 }
0x2284   :  { %v1696_v39 = vpop.permute.xlu0 %1695 }
0x2285   :  { %v1698_v40 = vadd.f32 %v1696_v39, %v1688_v38  ;;  %v2027_v38 = vld [vmem:[#allocation12 + $0x10] sm:$0xff]  ;;  %v2026_v39 = vld [vmem:[#allocation12 + $0x8] sm:$0xff] }
0x2287   :  { %2584 = vtanh.f32 %v1698_v40 }
0x2294   :  { %v2585_v41 = vpop.eup %2584 }
0x2295   :  { %1701 = vrot.lane.b32.xlu1 %v2585_v41, %s2770_s14 }
0x2307   :  { %v1702_v42 = vpop.permute.xlu1 %1701 }
0x2308   :  { %v1704_v11 = vmul.f32 %v2583_v34, %v1702_v42 }
0x230a   :  { %1706 = vrot.lane.b32.xlu0 %v1704_v11, %s2771_s3 }
0x237c   :  { %v1707_v43 = vpop.permute.xlu0 %1706 }
0x237d   :  { %2434 = vmatmul.mubr.msk.f32.vlgmr.msra.gmra.mxu1 %vm212_vm3, %v1707_v43 }
0x237e   :  { %2448 = vmatpush3.msra.mxu1 %v3030_v51  ;;  %2455 = vmatprep.mubr.msk.f32.mxu1 %vm2769_vm0, %v2768_v0 }
0x237f   :  { %2449 = vmatprep.subr.mxu1 %v2768_v0 }
0x2380   :  { %2450 = vmatpush3.msra.mxu1 %v3033_v52 }
0x2381   :  { %2451 = vmatprep.subr.mxu1 %v2768_v0 }
0x2382   :  { %2452 = vmatpush3.msra.mxu1 %v3036_v2 }
0x2383   :  { %2453 = vmatprep.subr.mxu1 %v2768_v0 }
0x2384   :  { %2454 = vmatpush3.msra.mxu1 %v3042_v54  ;;  %v1792_v54 = vrot.slane %v1698_v40, 6  ;;  %v2025_v40 = vld [vmem:[#allocation12] sm:$0xff] }
0x243d   :  { %v1776_v44 = vpop.f32.mrf.mxu1 }
0x243e   :  { %v1781_v45 = vrot.slane %v1776_v44, 6 }
0x243f   :  { %v2435_v46 = vpop.f32.mrf.mxu1 }
0x2440   :  { %v1783_v51 = vadd.f32 %v1781_v45, %v3077_v63  ;;  %v2167_v45 = vld [vmem:[%s3197_s8] ss:$0 sm:$0xff] }
0x2442   :  { %2586 = vtanh.f32 %v1783_v51  ;;  %v2162_v48 = vmul.f32 -1.442695, %v1783_v51 }
0x2444   :  { %2588 = vpow2.f32 %v2162_v48 }
0x244f   :  { %v2587_v47 = vpop.eup %2586 }
0x2450   :  { %1796 = vrot.lane.b32.xlu1 %v2587_v47, %s2770_s14 }
0x2451   :  { %v2589_v52 = vpop.eup %2588 }
0x2452   :  { %v1787_v30 = vadd.f32 1.0, %v2589_v52 }
0x2454   :  { %2590 = vrcp.f32 %v1787_v30 }
0x2461   :  { %v2591_v49 = vpop.eup %2590 }
0x2462   :  { %v1794_v53 = vmul.f32 %v2591_v49, %v1792_v54 }
0x24c2   :  { %v1797_v2 = vpop.permute.xlu1 %1796 }
0x24c3   :  { %v1799_v50 = vmul.f32 %v2591_v49, %v1797_v2 }
0x24c5   :  { %1801 = vrot.lane.b32.xlu0 %v1799_v50, %s2771_s3 }
0x2537   :  { %v1802_v9 = vpop.permute.xlu0 %1801 }
0x2538   :  { %v1804_v55 = vadd.f32 %v1802_v9, %v1794_v53 }
0x253a   :  { %2592 = vtanh.f32 %v1804_v55  ;;  %v1899_v15 = vrot.slane %v1804_v55, 6 }
0x2547   :  { %v2593_v4 = vpop.eup %2592 }
0x2548   :  { %1807 = vrot.lane.b32.xlu1 %v2593_v4, %s2770_s14 }
0x25ba   :  { %v1808_v56 = vpop.permute.xlu1 %1807 }
0x25bb   :  { %v1810_v57 = vmul.f32 %v2591_v49, %v1808_v56 }
0x25bd   :  { %v1812_v7 = vrot.slane %v1810_v57, 2 }
0x25bf   :  { %1813 = vrot.lane.b32.xlu0 %v1812_v7, %s2771_s3 }
0x2631   :  { %v1814_v58 = vpop.permute.xlu0 %1813 }
0x2632   :  { %2445 = vmatmul.mubr.msk.f32.vlgmr.msra.gmra.mxu0 %vm212_vm3, %v1814_v58 }
0x2633   :  { %2466 = vmatprep.mubr.msk.f32.mxu0 %vm2769_vm0, %v2768_v0 }
0x26f2   :  { %v1883_v59 = vpop.f32.mrf.mxu0 }
0x26f3   :  { %v1888_v8 = vrot.slane %v1883_v59, 4 }
0x26f4   :  { %v2446_v60 = vpop.f32.mrf.mxu0 }
0x26f5   :  { %v1890_v61 = vadd.f32 %v1888_v8, %v3077_v63 }
0x26f7   :  { %2594 = vtanh.f32 %v1890_v61  ;;  %v2164_v1 = vmul.f32 -1.442695, %v1890_v61 }
0x26f9   :  { %2596 = vpow2.f32 %v2164_v1 }
0x2704   :  { %v2595_v62 = vpop.eup %2594 }
0x2705   :  { %1903 = vrot.lane.b32.xlu1 %v2595_v62, %s2770_s14 }
0x2706   :  { %v2597_v5 = vpop.eup %2596 }
0x2707   :  { %v1894_v6 = vadd.f32 1.0, %v2597_v5 }
0x2709   :  { %2598 = vrcp.f32 %v1894_v6 }
0x2716   :  { %v2599_v10 = vpop.eup %2598 }
0x2717   :  { %v1901_v16 = vmul.f32 %v2599_v10, %v1899_v15 }
0x2777   :  { %v1904_v12 = vpop.permute.xlu1 %1903 }
0x2778   :  { %v1906_v14 = vmul.f32 %v2599_v10, %v1904_v12 }
0x277a   :  { %1908 = vrot.lane.b32.xlu0 %v1906_v14, %s2771_s3 }
0x27ec   :  { %v1909_v17 = vpop.permute.xlu0 %1908 }
0x27ed   :  { %v1911_v18 = vadd.f32 %v1909_v17, %v1901_v16 }
0x27ef   :  { %2600 = vtanh.f32 %v1911_v18  ;;  %v2006_v34 = vrot.slane %v1911_v18, 6 }
0x27fc   :  { %v2601_v19 = vpop.eup %2600 }
0x27fd   :  { %1914 = vrot.lane.b32.xlu1 %v2601_v19, %s2770_s14 }
0x286f   :  { %v1915_v20 = vpop.permute.xlu1 %1914 }
0x2870   :  { %v1917_v21 = vmul.f32 %v2599_v10, %v1915_v20 }
0x2872   :  { %v1919_v22 = vrot.slane %v1917_v21, 4 }
0x2874   :  { %1920 = vrot.lane.b32.xlu0 %v1919_v22, %s2771_s3 }
0x28e6   :  { %v1921_v3 = vpop.permute.xlu0 %1920 }
0x28e7   :  { %2456 = vmatmul.mubr.msk.f32.vlgmr.msra.gmra.mxu1 %vm212_vm3, %v1921_v3 }
0x29a7   :  { %v1990_v23 = vpop.f32.mrf.mxu1 }
0x29a8   :  { %v1995_v24 = vrot.slane %v1990_v23, 2 }
0x29a9   :  { %v2457_v25 = vpop.f32.mrf.mxu1 }
0x29aa   :  { %v1997_v26 = vadd.f32 %v1995_v24, %v3077_v63  ;;  %v2028_v63 = vld [vmem:[#allocation12 + $0x18] sm:$0xff] }
0x29ab   :  { %2459 = vmatpush3.msra.mxu0 %v2028_v63 }
0x29ac   :  { %2602 = vtanh.f32 %v1997_v26  ;;  %v2166_v28 = vmul.f32 -1.442695, %v1997_v26  ;;  %2460 = vmatprep.subr.mxu0 %v2768_v0 }
0x29ad   :  { %2461 = vmatpush3.msra.mxu0 %v2027_v38 }
0x29ae   :  { %2604 = vpow2.f32 %v2166_v28  ;;  %2462 = vmatprep.subr.mxu0 %v2768_v0 }
0x29af   :  { %2463 = vmatpush3.msra.mxu0 %v2026_v39 }
0x29b0   :  { %2464 = vmatprep.subr.mxu0 %v2768_v0 }
0x29b1   :  { %2465 = vmatpush3.msra.mxu0 %v2025_v40 }
0x29b9   :  { %v2603_v27 = vpop.eup %2602 }
0x29ba   :  { %2010 = vrot.lane.b32.xlu1 %v2603_v27, %s2770_s14 }
0x29bb   :  { %v2605_v13 = vpop.eup %2604 }
0x29bc   :  { %v2001_v29 = vadd.f32 1.0, %v2605_v13 }
0x29be   :  { %2606 = vrcp.f32 %v2001_v29 }
0x29cb   :  { %v2607_v31 = vpop.eup %2606 }
0x29cc   :  { %v2008_v35 = vmul.f32 %v2607_v31, %v2006_v34 }
0x2a2c   :  { %v2011_v32 = vpop.permute.xlu1 %2010 }
0x2a2d   :  { %v2013_v33 = vmul.f32 %v2607_v31, %v2011_v32 }
0x2a2f   :  { %2015 = vrot.lane.b32.xlu0 %v2013_v33, %s2771_s3 }
0x2aa1   :  { %v2016_v36 = vpop.permute.xlu0 %2015 }
0x2aa2   :  { %v2018_v37 = vadd.f32 %v2016_v36, %v2008_v35 }
0x2aa4   :  { %2608 = vtanh.f32 %v2018_v37 }
0x2ab1   :  { %v2609_v41 = vpop.eup %2608 }
0x2ab2   :  { %2021 = vrot.lane.b32.xlu1 %v2609_v41, %s2770_s14 }
0x2b24   :  { %v2022_v42 = vpop.permute.xlu1 %2021 }
0x2b25   :  { %v2024_v11 = vmul.f32 %v2607_v31, %v2022_v42 }
0x2b27   :  { %v2037_v43 = vrot.slane %v2024_v11, 6 }
0x2b29   :  { %2038 = vrot.lane.b32.xlu0 %v2037_v43, %s2771_s3 }
0x2b9b   :  { %v2039_v44 = vpop.permute.xlu0 %2038 }
0x2b9c   :  { %2467 = vmatmul.mubr.msk.f32.vlgmr.msra.gmra.mxu0 %vm212_vm3, %v2039_v44 }
0x2c5c   :  { %v2108_v46 = vpop.f32.mrf.mxu0 }
0x2c5d   :  { %v2109_v0 = vadd.f32 %v2167_v45, %v2108_v46 }
0x2c5e   :  { %v2468_v51 = vpop.f32.mrf.mxu0 }
0x2c5f   :  { %2112 = vst [vmem:[#allocation14] sm:$0x3] %v2109_v0 }
0x2c60   :  { %2741 = shalt.err (!%p2738_p6)
}
0x2c61   :  { %2122 = dma.vmem_to_hbm [thread:$0]  %s2120_s21, 32, %s3198_s9, [#allocation5]  }
0x2c62   :  { %2758 = dma.done.wait [#allocation5], 32  }
0x2c63   :  { %2759 = vsyncadd [#allocation5], 4294967264 }
0x2c64   :  { %2126 = vsyncpa [#allocation4], 1 }
0x2c65   :  { %2127 = vsyncpa [#allocation7], 1 }
0x2c66   :  { %2128 = vsyncpa [#allocation10], 1 }
0x2c67   :  { %2129 = vsyncpa [#allocation13], 1 }
0x2c68   :  { %2130 = vsyncpa [#allocation5], 1 }

</bundles_post_ra>
